<compile_context>
chip_gen: v5e
topology: v5e:2x2
jax: 0.10.0
libtpu: 0.0.40
codegen_flags: <defaults>
</compile_context>

<pallas_src>
import functools

import jax
import jax.numpy as jnp
from jax.experimental import pallas as pl
from jax.experimental.pallas import tpu as pltpu


def _round_up(x, m):
    return ((x + m - 1) // m) * m


def _ssim_kernel(dr_ref, pred_ref, targ_ref, bw_ref, bh_ref, out_ref,
                 *, win, k1, k2, ho, wo):
    # pred_ref / targ_ref: (1, Hs, Wp) f32 VMEM blocks (one frame, zero padded)
    # dr_ref:              (B,)        f32 SMEM (scalar-prefetched data_range)
    # bw_ref:              (Wp, Wop)   banded horizontal box matrix (scaled 1/win)
    # bh_ref:              (Hop, Hs)   banded vertical box matrix (scaled 1/win)
    # out_ref:             (1, 1, Wop) per-frame lane-dense partial sums
    hs = pred_ref.shape[1]
    hop = bh_ref.shape[0]
    wop = bw_ref.shape[1]

    x = pred_ref[0]                          # (Hs, Wp)
    y = targ_ref[0]                          # (Hs, Wp)

    dr = dr_ref[pl.program_id(0)]            # per-frame scalar from SMEM
    c1 = (k1 * dr) ** 2
    c2 = (k2 * dr) ** 2

    npix = float(win * win)
    cov_norm = npix / (npix - 1.0)

    # --- horizontal 7-tap "valid" filter: one MXU matmul for all five fields ---
    # Fields stacked along sublanes; Hs is a multiple of 8 so every sub-block
    # boundary is tile aligned.
    fields = jnp.concatenate([x, y, x * x, y * y, x * y], axis=0)   # (5*Hs, Wp)
    th = jnp.dot(fields, bw_ref[...],
                 preferred_element_type=jnp.float32,
                 precision=jax.lax.Precision.HIGHEST)               # (5*Hs, Wop)

    # --- vertical pass: restack along lanes (Wop multiple of 128), one matmul ---
    th2 = jnp.concatenate([th[k * hs:(k + 1) * hs, :] for k in range(5)],
                          axis=1)                                   # (Hs, 5*Wop)
    u = jnp.dot(bh_ref[...], th2,
                preferred_element_type=jnp.float32,
                precision=jax.lax.Precision.HIGHEST)                # (Hop, 5*Wop)

    ux = u[:, 0 * wop:1 * wop]
    uy = u[:, 1 * wop:2 * wop]
    uxx = u[:, 2 * wop:3 * wop]
    uyy = u[:, 3 * wop:4 * wop]
    uxy = u[:, 4 * wop:5 * wop]

    vx = cov_norm * (uxx - ux * ux)
    vy = cov_norm * (uyy - uy * uy)
    vxy = cov_norm * (uxy - ux * uy)

    a1 = 2.0 * ux * uy + c1
    a2 = 2.0 * vxy + c2
    b1 = ux * ux + uy * uy + c1
    b2 = vx + vy + c2

    s = (a1 * a2) * pl.reciprocal(b1 * b2, approx=False)

    # Mask padded output rows/columns so they contribute exactly zero.
    ri = jax.lax.broadcasted_iota(jnp.int32, (hop, wop), 0)
    ci = jax.lax.broadcasted_iota(jnp.int32, (hop, wop), 1)
    lmap = jnp.where((ri < ho) & (ci < wo), 1.0 - s, 0.0)

    partial = jnp.sum(lmap, axis=0, keepdims=True)                  # (1, Wop)
    out_ref[...] = partial.reshape(1, 1, wop)


def ssim_loss(pred, targ, data_range, *, win_size=7, k1=0.01, k2=0.03):
    """Matches SSIMLoss(win_size, k1, k2, mode='2d').forward(pred, targ, data_range)."""
    if jnp.iscomplexobj(pred):
        pred = jnp.abs(pred)
    if jnp.iscomplexobj(targ):
        targ = jnp.abs(targ)
    if pred.ndim == 4:                       # (N, C, H, W) -> (N, C, 1, H, W)
        pred = pred[:, :, None]
        targ = targ[:, :, None]
    n, c, t, h, w = pred.shape
    assert c == 1, "conv3d weight has in_channels == 1, so C must be 1"
    assert h >= win_size and w >= win_size

    b = n * t
    x = pred.reshape(b, h, w).astype(jnp.float32)
    y = targ.reshape(b, h, w).astype(jnp.float32)
    dr = jnp.repeat(data_range.astype(jnp.float32), t)              # (B,)

    ho = h - win_size + 1
    wo = w - win_size + 1
    hs = _round_up(h, 8)                     # sublane-aligned input height
    wp = _round_up(w, 128)                   # lane-dense input width
    hop = _round_up(ho, 8)                   # sublane-aligned output height
    wop = _round_up(wo, 128)                 # lane-dense output width

    if hs > h or wp > w:
        x = jnp.pad(x, ((0, 0), (0, hs - h), (0, wp - w)))
        y = jnp.pad(y, ((0, 0), (0, hs - h), (0, wp - w)))

    inv_win = jnp.float32(1.0 / win_size)

    # Banded 0/(1/win) matrices implementing the separable "valid" box filter.
    jcol = jnp.arange(wp, dtype=jnp.int32)[:, None]                 # input col j
    jout = jnp.arange(wop, dtype=jnp.int32)[None, :]                # output col jo
    bw = (((jcol >= jout) & (jcol <= jout + (win_size - 1)) & (jout < wo))
          .astype(jnp.float32) * inv_win)                           # (Wp, Wop)

    iout = jnp.arange(hop, dtype=jnp.int32)[:, None]                # output row io
    irow = jnp.arange(hs, dtype=jnp.int32)[None, :]                 # input row i
    bh = (((irow >= iout) & (irow <= iout + (win_size - 1)) & (iout < ho))
          .astype(jnp.float32) * inv_win)                           # (Hop, Hs)

    kern = functools.partial(_ssim_kernel, win=win_size, k1=k1, k2=k2,
                             ho=ho, wo=wo)

    partials = pl.pallas_call(
        kern,
        out_shape=jax.ShapeDtypeStruct((b, 1, wop), jnp.float32),
        grid_spec=pltpu.PrefetchScalarGridSpec(
            num_scalar_prefetch=1,                                  # data_range -> SMEM
            grid=(b,),
            in_specs=[
                pl.BlockSpec((1, hs, wp), lambda i, dr_s: (i, 0, 0)),
                pl.BlockSpec((1, hs, wp), lambda i, dr_s: (i, 0, 0)),
                pl.BlockSpec((wp, wop), lambda i, dr_s: (0, 0)),
                pl.BlockSpec((hop, hs), lambda i, dr_s: (0, 0)),
            ],
            out_specs=pl.BlockSpec((1, 1, wop), lambda i, dr_s: (i, 0, 0)),
        ),
        compiler_params=pltpu.CompilerParams(
            dimension_semantics=("parallel",),                      # megacore on v7x
            vmem_limit_bytes=32 * 1024 * 1024,                      # safe on v5e/v6e/v7x
        ),
    )(dr, x, y, bw, bh)

    return jnp.sum(partials) / (b * ho * wo)


def _reference(pred, targ, data_range, win_size=7, k1=0.01, k2=0.03):
    """Pure-JAX replica of the PyTorch module forward (mode='2d') for checking."""
    if jnp.iscomplexobj(pred):
        pred = jnp.abs(pred)
    if jnp.iscomplexobj(targ):
        targ = jnp.abs(targ)
    if pred.ndim == 4:
        pred = pred[:, :, None]
        targ = targ[:, :, None]
    n, c, t, h, w = pred.shape
    p = pred.reshape(n * c * t, 1, h, w).astype(jnp.float32)
    q = targ.reshape(n * c * t, 1, h, w).astype(jnp.float32)
    dr = jnp.repeat(data_range.astype(jnp.float32), c * t)[:, None, None, None]

    wgt = jnp.ones((1, 1, win_size, win_size), jnp.float32)
    np_ = float(win_size * win_size)
    wgt = wgt / np_
    cov_norm = np_ / (np_ - 1.0)

    def conv(a):
        return jax.lax.conv_general_dilated(
            a, wgt, (1, 1), "VALID",
            dimension_numbers=("NCHW", "OIHW", "NCHW"),
            precision=jax.lax.Precision.HIGHEST)

    c1 = (k1 * dr) ** 2
    c2 = (k2 * dr) ** 2
    ux, uy = conv(p), conv(q)
    uxx, uyy, uxy = conv(p * p), conv(q * q), conv(p * q)
    vx = cov_norm * (uxx - ux * ux)
    vy = cov_norm * (uyy - uy * uy)
    vxy = cov_norm * (uxy - ux * uy)
    a1, a2 = 2 * ux * uy + c1, 2 * vxy + c2
    b1, b2 = ux ** 2 + uy ** 2 + c1, vx + vy + c2
    s = a1 * a2 / (b1 * b2)
    return jnp.mean(1.0 - s)


if __name__ == "__main__":
    key = jax.random.PRNGKey(0)
    k_pred, k_targ, k_dr = jax.random.split(key, 3)

    # Case 1: 4D input (N, C=1, H, W), aligned spatial dims.
    N, C, H, W = 2, 1, 16, 16
    pred = jax.random.uniform(k_pred, (N, C, H, W), jnp.float32)
    targ = jax.random.uniform(k_targ, (N, C, H, W), jnp.float32)
    data_range = 0.5 + jax.random.uniform(k_dr, (N,), jnp.float32)

    loss = jax.block_until_ready(ssim_loss(pred, targ, data_range))
    ref = jax.block_until_ready(_reference(pred, targ, data_range))
    assert jnp.allclose(loss, ref, atol=1e-4, rtol=1e-4), (loss, ref)

    # Case 2: 5D input (N, C=1, T, H, W) with unaligned spatial dims
    # (exercises the H/W padding and output masking paths).
    ka, kb, kc = jax.random.split(jax.random.PRNGKey(1), 3)
    pred2 = jax.random.uniform(ka, (1, 1, 3, 18, 20), jnp.float32)
    targ2 = jax.random.uniform(kb, (1, 1, 3, 18, 20), jnp.float32)
    dr2 = 0.5 + jax.random.uniform(kc, (1,), jnp.float32)

    loss2 = jax.block_until_ready(ssim_loss(pred2, targ2, dr2))
    ref2 = jax.block_until_ready(_reference(pred2, targ2, dr2))
    assert jnp.allclose(loss2, ref2, atol=1e-4, rtol=1e-4), (loss2, ref2)

    print("KERNEL_OK")
</pallas_src>

<mosaic_0001>
module attributes {stable_mosaic.version = 11 : i64} {
  func.func @_ssim_kernel(%arg0: i32, %arg1: memref<2xf32, #tpu.memory_space<smem>>, %arg2: memref<1x16x128xf32, #tpu.memory_space<vmem>>, %arg3: memref<1x16x128xf32, #tpu.memory_space<vmem>>, %arg4: memref<128x128xf32, #tpu.memory_space<vmem>>, %arg5: memref<16x16xf32, #tpu.memory_space<vmem>>, %arg6: memref<1x1x128xf32, #tpu.memory_space<vmem>>) attributes {dimension_semantics = [#tpu.dimension_semantics<parallel>], iteration_bounds = array<i64: 2>, scalar_prefetch = 1 : i64, scratch_operands = 0 : i64, tpu.core_type = #tpu.core_type<tc>, window_params = [{transform_indices = @transform_0, window_bounds = array<i64: 1, 16, 128>}, {transform_indices = @transform_1, window_bounds = array<i64: 1, 16, 128>}, {pipeline_mode = #tpu.pipeline_mode<synchronous>, transform_indices = @transform_2, window_bounds = array<i64: 128, 128>}, {pipeline_mode = #tpu.pipeline_mode<synchronous>, transform_indices = @transform_3, window_bounds = array<i64: 16, 16>}, {transform_indices = @transform_4, window_bounds = array<i64: 1, 1, 128>}]} {
    %c0 = arith.constant 0 : index
    %c0_0 = arith.constant 0 : index
    %c0_1 = arith.constant 0 : index
    %0 = vector.load %arg2[%c0, %c0_0, %c0_1] : memref<1x16x128xf32, #tpu.memory_space<vmem>>, vector<1x16x128xf32>
    %1 = vector.shape_cast %0 : vector<1x16x128xf32> to vector<16x128xf32>
    %c0_2 = arith.constant 0 : index
    %c0_3 = arith.constant 0 : index
    %c0_4 = arith.constant 0 : index
    %2 = vector.load %arg3[%c0_2, %c0_3, %c0_4] : memref<1x16x128xf32, #tpu.memory_space<vmem>>, vector<1x16x128xf32>
    %3 = vector.shape_cast %2 : vector<1x16x128xf32> to vector<16x128xf32>
    %4 = arith.index_cast %arg0 : i32 to index
    %5 = memref.load %arg1[%4] : memref<2xf32, #tpu.memory_space<smem>>
    %cst = arith.constant 0.00999999977 : f32
    %6 = arith.mulf %cst, %5 : f32
    %7 = arith.mulf %6, %6 : f32
    %cst_5 = arith.constant 3.000000e-02 : f32
    %8 = arith.mulf %cst_5, %5 : f32
    %9 = arith.mulf %8, %8 : f32
    %10 = arith.mulf %1, %1 : vector<16x128xf32>
    %11 = arith.mulf %3, %3 : vector<16x128xf32>
    %12 = arith.mulf %1, %3 : vector<16x128xf32>
    %13 = tpu.concatenate %1, %3, %10, %11, %12 in 0 : vector<16x128xf32>, vector<16x128xf32>, vector<16x128xf32>, vector<16x128xf32>, vector<16x128xf32> -> vector<80x128xf32>
    %c0_6 = arith.constant 0 : index
    %c0_7 = arith.constant 0 : index
    %14 = vector.load %arg4[%c0_6, %c0_7] : memref<128x128xf32, #tpu.memory_space<vmem>>, vector<128x128xf32>
    %cst_8 = arith.constant dense<0.000000e+00> : vector<80x128xf32>
    %15 = tpu.matmul %13, %14, %cst_8 {dimension_numbers = #tpu.dot_dimension_numbers<[1], [0], [0], [1], [0, 0, 1, 1], [], []>, precision = #tpu.contract_precision<fp32>} : vector<80x128xf32>, vector<128x128xf32>, vector<80x128xf32> -> vector<80x128xf32>
    %16 = vector.extract_strided_slice %15 {offsets = [0, 0], sizes = [16, 128], strides = [1, 1]} : vector<80x128xf32> to vector<16x128xf32>
    %17 = vector.extract_strided_slice %15 {offsets = [16, 0], sizes = [16, 128], strides = [1, 1]} : vector<80x128xf32> to vector<16x128xf32>
    %18 = vector.extract_strided_slice %15 {offsets = [32, 0], sizes = [16, 128], strides = [1, 1]} : vector<80x128xf32> to vector<16x128xf32>
    %19 = vector.extract_strided_slice %15 {offsets = [48, 0], sizes = [16, 128], strides = [1, 1]} : vector<80x128xf32> to vector<16x128xf32>
    %20 = vector.extract_strided_slice %15 {offsets = [64, 0], sizes = [16, 128], strides = [1, 1]} : vector<80x128xf32> to vector<16x128xf32>
    %21 = tpu.concatenate %16, %17, %18, %19, %20 in 1 : vector<16x128xf32>, vector<16x128xf32>, vector<16x128xf32>, vector<16x128xf32>, vector<16x128xf32> -> vector<16x640xf32>
    %c0_9 = arith.constant 0 : index
    %c0_10 = arith.constant 0 : index
    %22 = vector.load %arg5[%c0_9, %c0_10] : memref<16x16xf32, #tpu.memory_space<vmem>>, vector<16x16xf32>
    %cst_11 = arith.constant dense<0.000000e+00> : vector<16x640xf32>
    %23 = tpu.matmul %22, %21, %cst_11 {dimension_numbers = #tpu.dot_dimension_numbers<[1], [0], [0], [1], [0, 0, 1, 1], [], []>, precision = #tpu.contract_precision<fp32>} : vector<16x16xf32>, vector<16x640xf32>, vector<16x640xf32> -> vector<16x640xf32>
    %24 = vector.extract_strided_slice %23 {offsets = [0, 0], sizes = [16, 128], strides = [1, 1]} : vector<16x640xf32> to vector<16x128xf32>
    %25 = vector.extract_strided_slice %23 {offsets = [0, 128], sizes = [16, 128], strides = [1, 1]} : vector<16x640xf32> to vector<16x128xf32>
    %26 = vector.extract_strided_slice %23 {offsets = [0, 256], sizes = [16, 128], strides = [1, 1]} : vector<16x640xf32> to vector<16x128xf32>
    %27 = vector.extract_strided_slice %23 {offsets = [0, 384], sizes = [16, 128], strides = [1, 1]} : vector<16x640xf32> to vector<16x128xf32>
    %28 = vector.extract_strided_slice %23 {offsets = [0, 512], sizes = [16, 128], strides = [1, 1]} : vector<16x640xf32> to vector<16x128xf32>
    %29 = arith.mulf %24, %24 : vector<16x128xf32>
    %30 = arith.subf %26, %29 : vector<16x128xf32>
    %cst_12 = arith.constant 1.02083337 : f32
    %31 = vector.broadcast %cst_12 : f32 to vector<16x128xf32>
    %32 = arith.mulf %31, %30 : vector<16x128xf32>
    %33 = arith.mulf %25, %25 : vector<16x128xf32>
    %34 = arith.subf %27, %33 : vector<16x128xf32>
    %cst_13 = arith.constant 1.02083337 : f32
    %35 = vector.broadcast %cst_13 : f32 to vector<16x128xf32>
    %36 = arith.mulf %35, %34 : vector<16x128xf32>
    %37 = arith.mulf %24, %25 : vector<16x128xf32>
    %38 = arith.subf %28, %37 : vector<16x128xf32>
    %cst_14 = arith.constant 1.02083337 : f32
    %39 = vector.broadcast %cst_14 : f32 to vector<16x128xf32>
    %40 = arith.mulf %39, %38 : vector<16x128xf32>
    %cst_15 = arith.constant 2.000000e+00 : f32
    %41 = vector.broadcast %cst_15 : f32 to vector<16x128xf32>
    %42 = arith.mulf %41, %24 : vector<16x128xf32>
    %43 = arith.mulf %42, %25 : vector<16x128xf32>
    %44 = vector.broadcast %7 : f32 to vector<16x128xf32>
    %45 = arith.addf %43, %44 : vector<16x128xf32>
    %cst_16 = arith.constant 2.000000e+00 : f32
    %46 = vector.broadcast %cst_16 : f32 to vector<16x128xf32>
    %47 = arith.mulf %46, %40 : vector<16x128xf32>
    %48 = vector.broadcast %9 : f32 to vector<16x128xf32>
    %49 = arith.addf %47, %48 : vector<16x128xf32>
    %50 = arith.mulf %24, %24 : vector<16x128xf32>
    %51 = arith.mulf %25, %25 : vector<16x128xf32>
    %52 = arith.addf %50, %51 : vector<16x128xf32>
    %53 = vector.broadcast %7 : f32 to vector<16x128xf32>
    %54 = arith.addf %52, %53 : vector<16x128xf32>
    %55 = arith.addf %32, %36 : vector<16x128xf32>
    %56 = vector.broadcast %9 : f32 to vector<16x128xf32>
    %57 = arith.addf %55, %56 : vector<16x128xf32>
    %58 = arith.mulf %45, %49 : vector<16x128xf32>
    %59 = arith.mulf %54, %57 : vector<16x128xf32>
    %60 = tpu.reciprocal %59 : vector<16x128xf32> -> vector<16x128xf32>
    %61 = arith.mulf %58, %60 : vector<16x128xf32>
    %62 = tpu.iota {dimensions = array<i32: 0>} : vector<16x128xi32>
    %63 = tpu.iota {dimensions = array<i32: 1>} : vector<16x128xi32>
    %c10_i32 = arith.constant 10 : i32
    %64 = vector.broadcast %c10_i32 : i32 to vector<16x128xi32>
    %65 = arith.cmpi slt, %62, %64 : vector<16x128xi32>
    %c10_i32_17 = arith.constant 10 : i32
    %66 = vector.broadcast %c10_i32_17 : i32 to vector<16x128xi32>
    %67 = arith.cmpi slt, %63, %66 : vector<16x128xi32>
    %68 = arith.andi %65, %67 : vector<16x128xi1>
    %cst_18 = arith.constant 1.000000e+00 : f32
    %69 = vector.broadcast %cst_18 : f32 to vector<16x128xf32>
    %70 = arith.subf %69, %61 : vector<16x128xf32>
    %cst_19 = arith.constant 0.000000e+00 : f32
    %71 = vector.broadcast %cst_19 : f32 to vector<16x128xf32>
    %72 = arith.select %68, %70, %71 : vector<16x128xi1>, vector<16x128xf32>
    %cst_20 = arith.constant dense<0.000000e+00> : vector<128xf32>
    %73 = vector.multi_reduction <add>, %72, %cst_20 [0] : vector<16x128xf32> to vector<128xf32>
    %74 = vector.shape_cast %73 : vector<128xf32> to vector<1x128xf32>
    %75 = vector.shape_cast %74 : vector<1x128xf32> to vector<1x1x128xf32>
    %c0_21 = arith.constant 0 : index
    %c0_22 = arith.constant 0 : index
    %c0_23 = arith.constant 0 : index
    %76 = vector.load %arg6[%c0_21, %c0_22, %c0_23] : memref<1x1x128xf32, #tpu.memory_space<vmem>>, vector<1x1x128xf32>
    tpu.vector_store %arg6[%c0_21, %c0_22, %c0_23], %75 {strides = array<i32>} : memref<1x1x128xf32, #tpu.memory_space<vmem>>, vector<1x1x128xf32>,
    return
  }
  func.func @transform_0(%arg0: i32, %arg1: memref<2xf32, #tpu.memory_space<smem>>) -> (i32, i32, i32) {
    %c0_i32 = arith.constant 0 : i32
    %c0_i32_0 = arith.constant 0 : i32
    %c0_i32_1 = arith.constant 0 : i32
    return %arg0, %c0_i32, %c0_i32_0 : i32, i32, i32
  }
  func.func @transform_1(%arg0: i32, %arg1: memref<2xf32, #tpu.memory_space<smem>>) -> (i32, i32, i32) {
    %c0_i32 = arith.constant 0 : i32
    %c0_i32_0 = arith.constant 0 : i32
    %c0_i32_1 = arith.constant 0 : i32
    return %arg0, %c0_i32, %c0_i32_0 : i32, i32, i32
  }
  func.func @transform_2(%arg0: i32, %arg1: memref<2xf32, #tpu.memory_space<smem>>) -> (i32, i32) {
    %c0_i32 = arith.constant 0 : i32
    %c0_i32_0 = arith.constant 0 : i32
    %c0_i32_1 = arith.constant 0 : i32
    return %c0_i32, %c0_i32_0 : i32, i32
  }
  func.func @transform_3(%arg0: i32, %arg1: memref<2xf32, #tpu.memory_space<smem>>) -> (i32, i32) {
    %c0_i32 = arith.constant 0 : i32
    %c0_i32_0 = arith.constant 0 : i32
    %c0_i32_1 = arith.constant 0 : i32
    return %c0_i32, %c0_i32_0 : i32, i32
  }
  func.func @transform_4(%arg0: i32, %arg1: memref<2xf32, #tpu.memory_space<smem>>) -> (i32, i32, i32) {
    %c0_i32 = arith.constant 0 : i32
    %c0_i32_0 = arith.constant 0 : i32
    %c0_i32_1 = arith.constant 0 : i32
    return %arg0, %c0_i32, %c0_i32_0 : i32, i32, i32
  }
}

</mosaic_0001>

<bundles_post_ra>
// kernel: tpu_custom_call.1
= control target key start
LH: loop header
LB: loop body
LE: loop exit
PB: predicated region body
PF: predicated region fallthrough
CT: control target
= control target key end

     0   :  { %s2439_s21 = smov [#allocation3]   ;;  %s3199_s0 = inlined_call_operand.hbm [shape: f32[2], index: 0, kind: input, shape index: {}]   ;;  %s3200_s1 = inlined_call_operand.hbm [shape: f32[2,16,128], index: 1, kind: input, shape index: {}]   ;;  %s3201_s2 = inlined_call_operand.hbm [shape: f32[2,16,128], index: 2, kind: input, shape index: {}]   ;;  %s3202_s3 = inlined_call_operand.hbm [shape: f32[128,128], index: 3, kind: input, shape index: {}]   ;;  %s3203_s4 = inlined_call_operand.hbm [shape: f32[16,16], index: 4, kind: input, shape index: {}]   ;;  %s3204_s5 = inlined_call_operand.hbm [shape: f32[2,1,128], index: 5, kind: output, shape index: {}]  }
   0x1   :  { %3215 = sst [smem:[#allocation19_spill]] %s3200_s1  ;;  %s11_s20 = sshll.u32 %s3199_s0, 4  ;;  %s12_s20 = int_to_ptr.hbm [resolvable:$true] %s11_s20 }
   0x2   :  { %3216 = sst [smem:[#allocation20_spill]] %s3202_s3 }
   0x3   :  { %3217 = sst [smem:[#allocation21_spill]] %s3203_s4 }
   0x4   :  { %14 = dma.hbm_to_smem %s12_s20, 16, %s2439_s21, [#allocation2] }
   0x5   :  { %2401 = dma.done.wait [#allocation2], 16 }
   0x6   :  { %2402 = vsyncadd [#allocation2], 4294967280 }
   0x7   :  { %17 = sfence }
   0x8   :  { %18 = vsyncpa [#allocation5], 0 }
   0x9   :  { %20 = vsyncpa [#allocation5 + $0x1], 0 }
   0xa   :  { %21 = vsyncpa [#allocation8], 0 }
   0xb   :  { %23 = vsyncpa [#allocation8 + $0x1], 0 }
   0xc   :  { %24 = vsyncpa [#allocation11], 0 }
   0xd   :  { %25 = vsyncpa [#allocation6], 0 }
   0xe   :  { %27 = vsyncpa [#allocation6 + $0x1], 0  ;;  %s2477_s22 = smov 0   ;;  %s2479_s23 = smov 0  }
   0xf   :  { %s2481_s24 = smov 0   ;;  %s2483_s0 = smov 0  }
  0x10 LB: > { %s2498_s25 = sadd.s32 4294967295, %s2437_s0   ;;  %s2126_s26 = sadd.s32 4294967294, %s2437_s0   ;;  %s2437_s0 = sphi %s2483_s0, %s3238_s0   ;;  %s2433_s24 = sphi %s2481_s24, %s3237_s24   ;;  %s2429_s23 = sphi %s2479_s23, %s3236_s23   ;;  %s2425_s22 = sphi %s2477_s22, %s3235_s22  }
  0x11   : > { %p53_p0 = scmp.ne.s32.totalorder %s2429_s23, %s2425_s22  ;;  %p54_p1 = scmp.eq.s32.totalorder %s2498_s25, 0 }
  0x12   : > { %p145_p2 = scmp.eq.s32.totalorder %s2498_s25, 1  ;;  %p151_p3 = scmp.eq.s32.totalorder %s2126_s26, 1 }
  0x13   : > { %p2507_p4 = por %p54_p1, %p53_p0  ;;  %p2127_p5 = scmp.ge.s32.totalorder %s2437_s0, 1 }
  0x14   : > { %p2512_p6 = por %p151_p3, %p53_p0  ;;  %p158_p7 = scmp.lt.s32.totalorder %s2437_s0, 3 }
  0x15   : > { %s3220_s3 = sld [smem:[#allocation20_spill]]  ;;  %s2440_s8 = smov [#allocation9]  }
  0x16   : > { %p2520_p8 = pnand %p2127_p5, %p158_p7  ;;  %s171_s9 = sshll.u32 %s2440_s8, 4  ;;  %s172_s9 = int_to_ptr.vmem [resolvable:$true] %s171_s9 }
  0x17   : > { %s3222_s4 = sld [smem:[#allocation21_spill]]  ;;  %s3205_s13 = smov 128  }
  0x18   : > { %p2160_p9 = pneg %p2520_p8  ;;  %s3207_s14 = smov 8  }
  0x19   : > { %s2443_s15 = smov [#allocation10]   ;;  %s2539_s17 = sadd.s32 1, %s2437_s0  }
  0x1a   : > { %p2161_p10 = pnand %p2160_p9, %p54_p1  ;;  %s185_s16 = sshll.u32 %s2443_s15, 4  ;;  %s186_s16 = int_to_ptr.vmem [resolvable:$true] %s185_s16 }
  0x1b   : > { %s169_s6 = sshll.u32 %s3220_s3, 4  ;;  %s40_s18 = sadd.s32 1, %s2433_s24  ;;  %s170_s6 = int_to_ptr.hbm [resolvable:$true] %s169_s6 }
  0x1c   : > { %2163 = dma.hbm_to_vmem [thread:$0]  (!%p2161_p10), %s170_s6, 2048, %s172_s9, [#allocation8], %s3205_s13, %s3205_s13, %s3207_s14  }
  0x1d   : > { %s183_s12 = sshll.u32 %s3222_s4, 4  ;;  %s37_s19 = ssub.s32 %s2437_s0, %s2539_s17  ;;  %s184_s12 = int_to_ptr.hbm [resolvable:$true] %s183_s12 }
  0x1e   : > { %2166 = dma.hbm_to_vmem [thread:$0]  (!%p2161_p10), %s184_s12, 256, %s186_s16, [#allocation11], %s3205_s13, %s3205_s13, %s3207_s14  }
  0x1f   : > { %p47_p12 = scmp.ne.s32.totalorder %s2433_s24, %s2429_s23  ;;  %p38_p13 = scmp.eq.s32.totalorder %s37_s19, 0 }
  0x20   : > { %p48_p0 = scmp.eq.s32.totalorder %s2437_s0, 0  ;;  %p2180_p5 = scmp.lt.s32.totalorder %s2437_s0, 2 }
  0x21   : > { %p2549_p3 = por %p145_p2, %p47_p12  ;;  %s199_s26 = sand.u32 1, %s2433_s24  }
  0x22   : > { %s2555_s21 = scalar_select %p38_p13, %s2433_s24, %s40_s18  }
  0x23   : > { %p49_p7 = por %p48_p0, %p47_p12  ;;  %s2558_s29 = sshll.u32 %s199_s26, 4 }
  0x24   : > { %s2144_s30 = sshll.u32 %s2437_s0, 4  ;;  %s3224_s1 = sld [smem:[#allocation19_spill]] }
  0x25   : > { %s203_s10 = scalar_lea.vmem [#allocation4], %s2558_s29  ;;  %p2565_p2 = pnand %p2180_p5, %p49_p7 }
  0x26   : > { %s211_s11 = sshll.u32 %s203_s10, 4  ;;  %s230_s19 = scalar_lea.hbm %s3201_s2, %s2144_s30  ;;  %s212_s11 = int_to_ptr.vmem [resolvable:$true] %s211_s11 }
  0x27   : > { %s231_s13 = sshll.u32 %s230_s19, 4  ;;  %s200_s14 = scalar_lea.sflag [#allocation5], %s199_s26  ;;  %s232_s13 = int_to_ptr.hbm [resolvable:$true] %s231_s13 }
  0x28   : > { %p2301_p10 = pneg %p2565_p2 }
  0x2a   : > { %s208_s9 = scalar_lea.hbm %s3224_s1, %s2144_s30  ;;  %s2304_s10 = scalar_lea.hbm %s3224_s1, 32 }
  0x2b   : > { %s209_s12 = sshll.u32 %s208_s9, 4  ;;  %s210_s12 = int_to_ptr.hbm [resolvable:$true] %s209_s12 }
  0x2c   : > { %s2297_s3 = sshra.s32 %s210_s12, 4  ;;  %s2298_s3 = int_to_ptr.hbm [resolvable:$true] %s2297_s3 }
  0x2d   : > { %s2299_s6 = scalar_lea.hbm %s2298_s3, 16  ;;  %p2305_p0 = scmp.lt.s32.totalorder %s2298_s3, %s3224_s1 }
  0x2e   : > { %p2300_p9 = scmp.ne.s32.totalorder %s2298_s3, %s2299_s6  ;;  %p2306_p5 = scmp.lt.s32.totalorder %s2304_s10, %s2299_s6 }
  0x30   : > { %p2302_p12 = pnand %p2301_p10, %p2300_p9  ;;  %p2307_p7 = por %p2306_p5, %p2305_p0 }
  0x32   : > { %p2303_p13 = pneg %p2302_p12 }
  0x34   : > { %p2308_p11 = pnand %p2307_p7, %p2303_p13 }
  0x36   : > { %2311 = shalt.err (!%p2308_p11)
}
  0x37   : > { %s3226_s26 = smov 8   ;;  %s3227_s30 = smov 128  }
  0x38   : > { %2170 = dma.hbm_to_vmem [thread:$0]  (!%p2565_p2), %s210_s12, 256, %s212_s11, %s200_s14, %s3227_s30, %s3227_s30, %s3226_s26  }
  0x39   : > { %s225_s19 = scalar_lea.vmem [#allocation7], %s2558_s29  ;;  %s221_s9 = sand.u32 1, %s2437_s0  }
  0x3a   : > { %s233_s8 = sshll.u32 %s225_s19, 4  ;;  %s222_s16 = scalar_lea.sflag [#allocation8], %s221_s9  ;;  %s234_s8 = int_to_ptr.vmem [resolvable:$true] %s233_s8 }
  0x3b   : > { %s2327_s3 = sshra.s32 %s232_s13, 4  ;;  %s2334_s1 = scalar_lea.hbm %s3201_s2, 32  ;;  %s2328_s3 = int_to_ptr.hbm [resolvable:$true] %s2327_s3 }
  0x3c   : > { %s2329_s6 = scalar_lea.hbm %s2328_s3, 16  ;;  %p2335_p13 = scmp.lt.s32.totalorder %s2328_s3, %s3201_s2 }
  0x3d   : > { %p2330_p9 = scmp.ne.s32.totalorder %s2328_s3, %s2329_s6  ;;  %p2336_p0 = scmp.lt.s32.totalorder %s2334_s1, %s2329_s6 }
  0x3f   : > { %p2332_p11 = pnand %p2330_p9, %p2301_p10  ;;  %p2337_p5 = por %p2336_p0, %p2335_p13 }
  0x41   : > { %p2333_p12 = pneg %p2332_p11 }
  0x43   : > { %p2338_p7 = pnand %p2337_p5, %p2333_p12 }
  0x45   : > { %2341 = shalt.err (!%p2338_p7)
}
  0x46   : > { %2173 = dma.hbm_to_vmem [thread:$0]  (!%p2565_p2), %s232_s13, 256, %s234_s8, %s222_s16, %s3227_s30, %s3227_s30, %s3226_s26  }
  0x47   : > { %245 = sbr.rel (%p2520_p8) target bundleno = 673 (0x2a1), region = 36  ;;  %s2607_s29 = sand.u32 (!%p2520_p8), 1, %s2429_s23  }
  0x48   : > { %s2138_s4 = sshll.u32 (!%p2520_p8), %s2607_s29, 4  ;;  %s248_s1 = scalar_lea.sflag (!%p2520_p8), [#allocation5], %s2607_s29 }
  0x49   : > { %s2611_s11 = scalar_lea.vmem (!%p2520_p8), [#allocation4], %s2138_s4 }
  0x4c   : > { %2404 = dma.done.wait (%p2507_p4), %s248_s1, 256  }
  0x4d   : > { %2406 = vsyncadd (%p2507_p4), %s248_s1, 4294967040  ;;  %s257_s13 = sand.u32 1, %s2498_s25   ;;  %s2618_s12 = scalar_lea.vmem [#allocation7], %s2138_s4 }
  0x4e   : > { %s258_s7 = scalar_lea.sflag [#allocation8], %s257_s13 }
  0x4f   : > { %2408 = dma.done.wait (%p2507_p4), %s258_s7, 256  }
  0x50   : > { %2410 = vsyncadd (%p2507_p4), %s258_s7, 4294967040 }
  0x51   : > { %2412 = dma.done.wait (%p54_p1), [#allocation8], 2048  }
  0x52   : > { %2414 = vsyncadd (%p54_p1), [#allocation8], 4294965248 }
  0x53   : > { %2416 = dma.done.wait (%p54_p1), [#allocation11], 256  }
  0x54   : > { %2418 = vsyncadd (%p54_p1), [#allocation11], 4294967040  ;;  %v331_v0 = vld [vmem:[#allocation9 + $0x78] sm:$0xff]  ;;  %v330_v1 = vld [vmem:[#allocation9 + $0x70] sm:$0xff]  ;;  %vm954_vm0 = vcmask 130048   ;;  %s305_s27 = sld [smem:[#allocation3 + %s2498_s25]]  ;;  %s2014_s16 = scalar_lea.hbm %s3204_s5, %s2498_s25 }
  0x55   : > { %v329_v2 = vld [vmem:[#allocation9 + $0x68] sm:$0xff]  ;;  %v2632_v3 = vand.u32 4294901760, %v331_v0  ;;  %v2634_v4 = vand.u32 4294901760, %v330_v1  ;;  %v328_v6 = vld [vmem:[#allocation9 + $0x60] sm:$0xff]  ;;  %v327_v7 = vld [vmem:[#allocation9 + $0x58] sm:$0xff]  ;;  %s300_s3 = scalar_lea.vmem [#allocation12], %s2607_s29 }
  0x56   : > { %v2636_v5 = vand.u32 4294901760, %v329_v2  ;;  %v326_v8 = vld [vmem:[#allocation9 + $0x50] sm:$0xff]  ;;  %v2638_v9 = vand.u32 4294901760, %v328_v6  ;;  %v2640_v10 = vand.u32 4294901760, %v327_v7  ;;  %v325_v12 = vld [vmem:[#allocation9 + $0x48] sm:$0xff]  ;;  %v324_v13 = vld [vmem:[#allocation9 + $0x40] sm:$0xff] }
  0x57   : > { %v2642_v11 = vand.u32 4294901760, %v326_v8  ;;  %333 = vmatpush.msra.mxu0 %v2632_v3  ;;  %v2646_v14 = vsub.f32 %v331_v0, %v2632_v3  ;;  %v2649_v15 = vsub.f32 %v330_v1, %v2634_v4  ;;  %682 = vmatpush.msra.mxu3 %v2632_v3  ;;  %v2655_v17 = vand.u32 4294901760, %v325_v12  ;;  %v323_v18 = vld [vmem:[#allocation9 + $0x38] sm:$0xff]  ;;  %v322_v29 = vld [vmem:[#allocation9 + $0x30] sm:$0xff]  ;;  %v321_v36 = vld [vmem:[#allocation9 + $0x28] sm:$0xff]  ;;  %s2016_s6 = sshll.u32 %s300_s3, 4  ;;  %s2017_s6 = int_to_ptr.vmem [resolvable:$true] %s2016_s6 }
  0x58   : > { %v2653_v16 = vsub.f32 %v329_v2, %v2636_v5  ;;  %v2658_v19 = vsub.f32 %v328_v6, %v2638_v9  ;;  %v2661_v20 = vsub.f32 %v327_v7, %v2640_v10  ;;  %v2663_v21 = vand.u32 4294901760, %v324_v13  ;;  %v320_v43 = vld [vmem:[#allocation9 + $0x20] sm:$0xff]  ;;  %v319_v49 = vld [vmem:[#allocation9 + $0x18] sm:$0xff]  ;;  %v318_v55 = vld [vmem:[#allocation9 + $0x10] sm:$0xff]  ;;  %s2018_s10 = sshll.u32 %s2014_s16, 4  ;;  %s2006_s18 = scalar_lea.sflag [#allocation6], %s2607_s29  ;;  %s2019_s10 = int_to_ptr.hbm [resolvable:$true] %s2018_s10 }
  0x59   : > { %v2666_v22 = vsub.f32 %v326_v8, %v2642_v11  ;;  %335 = vmatpush.msra.mxu0 %v2634_v4  ;;  %584 = vmatpush.msra.mxu2 %v2646_v14  ;;  %v447_v23 = vand.u32 4294901760, %v2646_v14  ;;  %v453_v24 = vand.u32 4294901760, %v2649_v15  ;;  %v2675_v27 = vand.u32 4294901760, %v323_v18  ;;  %v2734_v56 = vld [vmem:[%s2611_s11] sm:$0xff]  ;;  %v317_v62 = vld [vmem:[#allocation9 + $0x8] sm:$0xff]  ;;  %s2371_s14 = sshra.s32 %s2019_s10, 4  ;;  %s2372_s14 = int_to_ptr.hbm [resolvable:$true] %s2371_s14 }
  0x5a   : > { %v459_v25 = vand.u32 4294901760, %v2653_v16  ;;  %684 = vmatpush.msra.mxu3 %v2634_v4  ;;  %v465_v26 = vand.u32 4294901760, %v2658_v19  ;;  %v2678_v28 = vsub.f32 %v325_v12, %v2655_v17  ;;  %v471_v33 = vand.u32 4294901760, %v2661_v20  ;;  %v316_v8 = vld [vmem:[#allocation9] sm:$0xff]  ;;  %s308_s15 = smul.f32 0.03, %s305_s27  ;;  %p2378_p2 = scmp.lt.s32.totalorder %s2372_s14, %s3204_s5 }
  0x5b   : > { %337 = vmatpush.msra.mxu0 %v2636_v5  ;;  %587 = vmatpush.msra.mxu2 %v2649_v15  ;;  %v448_v30 = vsub.f32 %v2646_v14, %v447_v23  ;;  %v454_v31 = vsub.f32 %v2649_v15, %v453_v24  ;;  %v477_v34 = vand.u32 4294901760, %v2666_v22  ;;  %v2695_v35 = vsub.f32 %v324_v13, %v2663_v21  ;;  %s306_s26 = smul.f32 0.01, %s305_s27  ;;  %s2373_s4 = scalar_lea.hbm %s2372_s14, 1 }
  0x5c   : > { %v460_v32 = vsub.f32 %v2653_v16, %v459_v25  ;;  %686 = vmatpush.msra.mxu3 %v2636_v5  ;;  %v466_v39 = vsub.f32 %v2658_v19, %v465_v26  ;;  %v2702_v40 = vand.u32 4294901760, %v322_v29  ;;  %v483_v41 = vand.u32 4294901760, %v2678_v28  ;;  %s309_s30 = smul.f32 %s308_s15, %s308_s15  ;;  %p2374_p1 = scmp.ne.s32.totalorder %s2372_s14, %s2373_s4 }
  0x5d   : > { %339 = vmatpush.msra.mxu0 %v2638_v9  ;;  %v449_v37 = vand.u32 4294901760, %v448_v30  ;;  %590 = vmatpush.msra.mxu2 %v2653_v16  ;;  %v455_v38 = vand.u32 4294901760, %v454_v31  ;;  %v2707_v42 = vsub.f32 %v323_v18, %v2675_v27  ;;  %v472_v45 = vsub.f32 %v2661_v20, %v471_v33  ;;  %v2774_v30 = vld [vmem:[%s2611_s11 + $0x8] sm:$0xff]  ;;  %s307_s19 = smul.f32 %s306_s26, %s306_s26  ;;  %s2377_s25 = scalar_lea.hbm %s3204_s5, 2 }
  0x5e   : > { %688 = vmatpush.msra.mxu3 %v2638_v9  ;;  %v461_v44 = vand.u32 4294901760, %v460_v32  ;;  %v2713_v46 = vand.u32 4294901760, %v321_v36  ;;  %v478_v47 = vsub.f32 %v2666_v22, %v477_v34  ;;  %v489_v48 = vand.u32 4294901760, %v2695_v35  ;;  %p2375_p4 = pnand %p2374_p1, %p2549_p3  ;;  %p2379_p10 = scmp.lt.s32.totalorder %s2377_s25, %s2373_s4 }
  0x5f   : > { %341 = vmatpush.msra.mxu0 %v2640_v10  ;;  %450 = vmatpush.msra.mxu1 %v449_v37  ;;  %v467_v50 = vand.u32 4294901760, %v466_v39  ;;  %v2722_v51 = vand.u32 4294901760, %v320_v43  ;;  %v2725_v52 = vsub.f32 %v322_v29, %v2702_v40  ;;  %v484_v53 = vsub.f32 %v2678_v28, %v483_v41 }
  0x60   : > { %593 = vmatpush.msra.mxu2 %v2658_v19  ;;  %690 = vmatpush.msra.mxu3 %v2640_v10  ;;  %v495_v54 = vand.u32 4294901760, %v2707_v42  ;;  %v473_v57 = vand.u32 4294901760, %v472_v45  ;;  %v2737_v58 = vand.u32 4294901760, %v319_v49  ;;  %v2740_v59 = vsub.f32 %v321_v36, %v2713_v46  ;;  %p2376_p8 = pneg %p2375_p4  ;;  %p2380_p9 = por %p2379_p10, %p2378_p2 }
  0x61   : > { %343 = vmatpush.msra.mxu0 %v2642_v11  ;;  %456 = vmatpush.msra.mxu1 %v455_v38  ;;  %v479_v60 = vand.u32 4294901760, %v478_v47  ;;  %v490_v61 = vsub.f32 %v2695_v35, %v489_v48  ;;  %v2748_v63 = vand.u32 4294901760, %v318_v55  ;;  %v501_v0 = vand.u32 4294901760, %v2725_v52 }
  0x62   : > { %596 = vmatpush.msra.mxu2 %v2661_v20  ;;  %692 = vmatpush.msra.mxu3 %v2642_v11  ;;  %v2752_v1 = vsub.f32 %v320_v43, %v2722_v51  ;;  %v2755_v2 = vand.u32 4294901760, %v2734_v56  ;;  %v485_v6 = vand.u32 4294901760, %v484_v53  ;;  %v496_v7 = vsub.f32 %v2707_v42, %v495_v54  ;;  %p2381_p11 = pnand %p2380_p9, %p2376_p8 }
  0x63   : > { %345 = vmatpush.msra.mxu0 %v2655_v17  ;;  %462 = vmatpush.msra.mxu1 %v461_v44  ;;  %v2763_v12 = vand.u32 4294901760, %v317_v62  ;;  %v3213_v13 = vand.u32 4294901760, %v2740_v59  ;;  %v2767_v18 = vsub.f32 %v319_v49, %v2737_v58  ;;  %v491_v31 = vand.u32 4294901760, %v490_v61 }
  0x64   : > { %599 = vmatpush.msra.mxu2 %v2666_v22  ;;  %694 = vmatpush.msra.mxu3 %v2655_v17  ;;  %v2771_v29 = vsub.f32 %v2734_v56, %v2755_v2  ;;  %v502_v32 = vsub.f32 %v2725_v52, %v501_v0  ;;  %v2782_v36 = vand.u32 4294901760, %v316_v8  ;;  %v3210_v37 = vand.u32 4294901760, %v2752_v1 }
  0x65   : > { %347 = vmatpush.msra.mxu0 %v2663_v21  ;;  %468 = vmatpush.msra.mxu1 %v467_v50  ;;  %v2786_v38 = vsub.f32 %v318_v55, %v2748_v63  ;;  %v2792_v43 = vand.u32 4294901760, %v2774_v30  ;;  %v497_v44 = vand.u32 4294901760, %v496_v7  ;;  %v508_v45 = vsub.f32 %v2740_v59, %v3213_v13  ;;  %v2852_v13 = vld [vmem:[%s2618_s12 + $0x8] sm:$0xff] }
  0x66   : > { %602 = vmatpush.msra.mxu2 %v2678_v28  ;;  %696 = vmatpush.msra.mxu3 %v2663_v21  ;;  %v366_v39 = vand.u32 4294901760, %v2771_v29  ;;  %v3209_v47 = vand.u32 4294901760, %v2767_v18  ;;  %v2800_v49 = vsub.f32 %v317_v62, %v2763_v12  ;;  %v503_v50 = vand.u32 4294901760, %v502_v32 }
  0x67   : > { %349 = vmatpush.msra.mxu0 %v2675_v27  ;;  %474 = vmatpush.msra.mxu1 %v473_v57  ;;  %v514_v53 = vsub.f32 %v2752_v1, %v3210_v37  ;;  %v3211_v55 = vand.u32 4294901760, %v2786_v38  ;;  %v2810_v57 = vsub.f32 %v316_v8, %v2782_v36  ;;  %v373_v61 = vsub.f32 %v2774_v30, %v2792_v43  ;;  %v2823_v8 = vld [vmem:[%s2618_s12] sm:$0xff] }
  0x68   : > { %605 = vmatpush.msra.mxu2 %v2695_v35  ;;  %698 = vmatpush.msra.mxu3 %v2675_v27  ;;  %v509_v62 = vand.u32 4294901760, %v508_v45  ;;  %v3212_v7 = vand.u32 4294901760, %v2800_v49  ;;  %v2835_v37 = vand.u32 4294901760, %v2823_v8  ;;  %v311_v19 = vmul.f32 %v2774_v30, %v2774_v30 }
  0x69   : > { %351 = vmatpush.msra.mxu0 %v2702_v40  ;;  %480 = vmatpush.msra.mxu1 %v479_v60  ;;  %v367_v60 = vsub.f32 %v2771_v29, %v366_v39  ;;  %v526_v32 = vsub.f32 %v2786_v38, %v3211_v55 }
  0x6a   : > { %608 = vmatpush.msra.mxu2 %v2707_v42  ;;  %700 = vmatpush.msra.mxu3 %v2702_v40  ;;  %v2890_v20 = vand.u32 4294901760, %v311_v19 }
  0x6b   : > { %353 = vmatpush.msra.mxu0 %v2713_v46  ;;  %486 = vmatpush.msra.mxu1 %v485_v6  ;;  %v520_v6 = vsub.f32 %v2767_v18, %v3209_v47  ;;  %v368_v45 = vand.u32 4294901760, %v367_v60  ;;  %v374_v47 = vand.u32 4294901760, %v373_v61  ;;  %v527_v60 = vand.u32 4294901760, %v526_v32 }
  0x6c   : > { %611 = vmatpush.msra.mxu2 %v2725_v52  ;;  %702 = vmatpush.msra.mxu3 %v2713_v46  ;;  %v405_v22 = vsub.f32 %v311_v19, %v2890_v20  ;;  %v3233_v52 = vand.u32 4294901760, %v2810_v57 }
  0x6d   : > { %355 = vmatpush.msra.mxu0 %v2722_v51  ;;  %492 = vmatpush.msra.mxu1 %v491_v31  ;;  %v515_v31 = vand.u32 4294901760, %v514_v53  ;;  %v532_v53 = vsub.f32 %v2800_v49, %v3212_v7 }
  0x6e   : > { %614 = vmatpush.msra.mxu2 %v2740_v59  ;;  %704 = vmatpush.msra.mxu3 %v2722_v51 }
  0x6f   : > { %357 = vmatpush.msra.mxu0 %v2737_v58  ;;  %498 = vmatpush.msra.mxu1 %v497_v44  ;;  %v3214_v44 = vand.u32 4294901760, %v2810_v57  ;;  %v533_v7 = vand.u32 4294901760, %v532_v53 }
  0x70   : > { %617 = vmatpush.msra.mxu2 %v2752_v1  ;;  %706 = vmatpush.msra.mxu3 %v2737_v58 }
  0x71   : > { %359 = vmatpush.msra.mxu0 %v2748_v63  ;;  %504 = vmatpush.msra.mxu1 %v503_v50  ;;  %v521_v50 = vand.u32 4294901760, %v520_v6  ;;  %v538_v55 = vsub.f32 %v2810_v57, %v3214_v44  ;;  %v381_v6 = vsub.f32 %v2823_v8, %v2835_v37  ;;  %v2857_v44 = vand.u32 4294901760, %v2852_v13 }
  0x72   : > { %620 = vmatpush.msra.mxu2 %v2767_v18  ;;  %708 = vmatpush.msra.mxu3 %v2748_v63 }
  0x73   : > { %361 = vmatpush.msra.mxu0 %v2763_v12  ;;  %510 = vmatpush.msra.mxu1 %v509_v62  ;;  %v375_v62 = vsub.f32 %v373_v61, %v374_v47 }
  0x74   : > { %623 = vmatpush.msra.mxu2 %v2786_v38  ;;  %710 = vmatpush.msra.mxu3 %v2763_v12 }
  0x75   : > { %363 = vmatpush.msra.mxu0 %v2782_v36  ;;  %516 = vmatpush.msra.mxu1 %v515_v31  ;;  %v539_v31 = vand.u32 4294901760, %v538_v55  ;;  %v376_v32 = vand.u32 4294901760, %v375_v62  ;;  %v310_v55 = vmul.f32 %v2734_v56, %v2734_v56 }
  0x76   : > { %369 = vmatmul.f32.vlgmr.msra.gmra.mxu0 %v368_v45  ;;  %626 = vmatpush.msra.mxu2 %v2800_v49  ;;  %v382_v45 = vand.u32 4294901760, %v381_v6 }
  0x77   : > { %522 = vmatpush.msra.mxu1 %v521_v50  ;;  %712 = vmatpush.msra.mxu3 %v2782_v36 }
  0x78   : > { %629 = vmatpush.msra.mxu2 %v2810_v57  ;;  %716 = vmatmul.f32.vlgmr.msra.gmra.mxu3 %v366_v39  ;;  %v383_v39 = vsub.f32 %v381_v6, %v382_v45 }
  0x79   : > { %528 = vmatpush.msra.mxu1 %v527_v60  ;;  %632 = vmatmul.f32.vlgmr.msra.gmra.mxu2 %v2771_v29  ;;  %v389_v29 = vsub.f32 %v2852_v13, %v2857_v44 }
  0x7a   : > { %777 = vmatpush.msrb.mxu0 %v447_v23  ;;  %v384_v14 = vand.u32 4294901760, %v383_v39  ;;  %v2873_v23 = vand.u32 4294901760, %v310_v55 }
  0x7b   : > { %534 = vmatpush.msra.mxu1 %v533_v7  ;;  %v390_v15 = vand.u32 4294901760, %v389_v29 }
  0x7c   : > { %781 = vmatpush.msrb.mxu0 %v453_v24  ;;  %v397_v16 = vsub.f32 %v310_v55, %v2873_v23  ;;  %v312_v24 = vmul.f32 %v2823_v8, %v2823_v8 }
  0x7d   : > { %540 = vmatpush.msra.mxu1 %v539_v31 }
  0x7e   : > { %377 = vmatmul.f32.gmra.mxu0 %v376_v32  ;;  %542 = vmatmul.f32.vlgmr.msra.gmra.mxu1 %v2755_v2  ;;  %v2907_v28 = vand.u32 4294901760, %v312_v24 }
  0x7f   : > { %785 = vmatpush.msrb.mxu0 %v459_v25  ;;  %880 = vmatpush.msrb.mxu1 %v2632_v3  ;;  %v391_v3 = vsub.f32 %v389_v29, %v390_v15  ;;  %v3228_v25 = vand.u32 4294901760, %v2740_v59 }
  0x80   : > { %722 = vmatmul.f32.gmra.mxu3 %v374_v47  ;;  %v413_v35 = vsub.f32 %v312_v24, %v2907_v28 }
  0x81   : > { %637 = vmatmul.f32.gmra.mxu2 %v373_v61  ;;  %789 = vmatpush.msrb.mxu0 %v465_v26  ;;  %v406_v26 = vand.u32 4294901760, %v405_v22 }
  0x82   : > { %882 = vmatpush.msrb.mxu1 %v2634_v4  ;;  %v392_v4 = vand.u32 4294901760, %v391_v3  ;;  %v414_v42 = vand.u32 4294901760, %v413_v35 }
  0x83   : > { %793 = vmatpush.msrb.mxu0 %v471_v33  ;;  %v3230_v33 = vand.u32 4294901760, %v2767_v18  ;;  %v315_v18 = vmul.f32 %v2852_v13, %v2774_v30 }
  0x84   : > { %884 = vmatpush.msrb.mxu1 %v2636_v5  ;;  %v398_v5 = vand.u32 4294901760, %v397_v16 }
  0x85   : > { %797 = vmatpush.msrb.mxu0 %v477_v34  ;;  %v3231_v34 = vand.u32 4294901760, %v2786_v38  ;;  %v436_v38 = vand.u32 4294901760, %v315_v18 }
  0x86   : > { %385 = vmatmul.f32.gmra.mxu0 %v384_v14  ;;  %546 = vmatmul.f32.gmra.mxu1 %v2792_v43 }
  0x87   : > { %801 = vmatpush.msrb.mxu0 %v483_v41  ;;  %886 = vmatpush.msrb.mxu1 %v2638_v9  ;;  %v399_v9 = vsub.f32 %v397_v16, %v398_v5  ;;  %v313_v41 = vmul.f32 %v2852_v13, %v2852_v13  ;;  %v437_v47 = vsub.f32 %v315_v18, %v436_v38 }
  0x88   : > { %728 = vmatmul.f32.gmra.mxu3 %v382_v45 }
  0x89   : > { %642 = vmatmul.f32.gmra.mxu2 %v381_v6  ;;  %805 = vmatpush.msrb.mxu0 %v489_v48  ;;  %v2923_v48 = vand.u32 4294901760, %v313_v41 }
  0x8a   : > { %888 = vmatpush.msrb.mxu1 %v2640_v10  ;;  %v3229_v10 = vand.u32 4294901760, %v2752_v1 }
  0x8b   : > { %809 = vmatpush.msrb.mxu0 %v495_v54  ;;  %v421_v54 = vsub.f32 %v313_v41, %v2923_v48 }
  0x8c   : > { %890 = vmatpush.msrb.mxu1 %v2642_v11  ;;  %v400_v11 = vand.u32 4294901760, %v399_v9 }
  0x8d   : > { %813 = vmatpush.msrb.mxu0 %v501_v0  ;;  %v422_v0 = vand.u32 4294901760, %v421_v54 }
  0x8e   : > { %393 = vmatmul.f32.gmra.mxu0 %v392_v4  ;;  %550 = vmatmul.f32.gmra.mxu1 %v2835_v37 }
  0x8f   : > { %817 = vmatpush.msrb.mxu0 %v3228_v25  ;;  %892 = vmatpush.msrb.mxu1 %v2655_v17  ;;  %v407_v17 = vsub.f32 %v405_v22, %v406_v26 }
  0x90   : > { %734 = vmatmul.f32.gmra.mxu3 %v390_v15 }
  0x91   : > { %647 = vmatmul.f32.gmra.mxu2 %v389_v29  ;;  %821 = vmatpush.msrb.mxu0 %v3229_v10 }
  0x92   : > { %894 = vmatpush.msrb.mxu1 %v2663_v21  ;;  %v3232_v21 = vand.u32 4294901760, %v2800_v49  ;;  %v438_v49 = vand.u32 4294901760, %v437_v47 }
  0x93   : > { %825 = vmatpush.msrb.mxu0 %v3230_v33 }
  0x94   : > { %896 = vmatpush.msrb.mxu1 %v2675_v27  ;;  %v408_v27 = vand.u32 4294901760, %v407_v17  ;;  %v439_v57 = vsub.f32 %v437_v47, %v438_v49  ;;  %v953_v17 = vld [vmem:[#allocation10 + $0x8] sm:$0xff] }
  0x95   : > { %829 = vmatpush.msrb.mxu0 %v3231_v34 }
  0x96   : > { %401 = vmatmul.f32.gmra.mxu0 %v400_v11  ;;  %554 = vmatmul.f32.gmra.mxu1 %v2857_v44  ;;  %v440_v13 = vand.u32 4294901760, %v439_v57 }
  0x97   : > { %898 = vmatpush.msrb.mxu1 %v2702_v40  ;;  %833 = vmatpush.msrb.mxu0 %v3232_v21  ;;  %v415_v40 = vsub.f32 %v413_v35, %v414_v42 }
  0x98   : > { %740 = vmatmul.f32.gmra.mxu3 %v398_v5 }
  0x99   : > { %652 = vmatmul.f32.gmra.mxu2 %v397_v16  ;;  %900 = vmatpush.msrb.mxu1 %v2713_v46  ;;  %v314_v46 = vmul.f32 %v2823_v8, %v2734_v56  ;;  %v416_v59 = vand.u32 4294901760, %v415_v40  ;;  %v959_v40 = vsel %vm954_vm0, %v953_v17, 0 }
  0x9a   : > { %837 = vmatpush.msrb.mxu0 %v3233_v52 }
  0x9b   : > { %902 = vmatpush.msrb.mxu1 %v2722_v51  ;;  %v428_v51 = vand.u32 4294901760, %v314_v46 }
  0x9d   : > { %904 = vmatpush.msrb.mxu1 %v2737_v58  ;;  %v423_v58 = vsub.f32 %v421_v54, %v422_v0  ;;  %v429_v1 = vsub.f32 %v314_v46, %v428_v51  ;;  %v2985_v46 = vand.u32 4294901760, %v959_v40 }
  0x9e   : > { %409 = vmatmul.f32.gmra.mxu0 %v408_v27  ;;  %558 = vmatmul.f32.gmra.mxu1 %v2873_v23 }
  0x9f   : > { %906 = vmatpush.msrb.mxu1 %v2748_v63  ;;  %v424_v56 = vand.u32 4294901760, %v423_v58  ;;  %v430_v63 = vand.u32 4294901760, %v429_v1 }
  0xa0   : > { %746 = vmatmul.f32.gmra.mxu3 %v406_v26 }
  0xa1   : > { %657 = vmatmul.f32.gmra.mxu2 %v405_v22  ;;  %908 = vmatpush.msrb.mxu1 %v2763_v12  ;;  %v431_v12 = vsub.f32 %v429_v1, %v430_v63 }
  0xa3   : > { %910 = vmatpush.msrb.mxu1 %v2782_v36  ;;  %v432_v36 = vand.u32 4294901760, %v431_v12 }
  0xa6   : > { %417 = vmatmul.f32.gmra.mxu0 %v416_v59  ;;  %562 = vmatmul.f32.gmra.mxu1 %v2890_v20 }
  0xa8   : > { %752 = vmatmul.f32.gmra.mxu3 %v414_v42 }
  0xa9   : > { %662 = vmatmul.f32.gmra.mxu2 %v413_v35 }
  0xae   : > { %425 = vmatmul.f32.gmra.mxu0 %v424_v56  ;;  %566 = vmatmul.f32.gmra.mxu1 %v2907_v28 }
  0xb0   : > { %758 = vmatmul.f32.gmra.mxu3 %v422_v0 }
  0xb1   : > { %667 = vmatmul.f32.gmra.mxu2 %v421_v54 }
  0xb6   : > { %433 = vmatmul.f32.gmra.mxu0 %v432_v36  ;;  %570 = vmatmul.f32.gmra.mxu1 %v2923_v48 }
  0xb8   : > { %764 = vmatmul.f32.gmra.mxu3 %v430_v63  ;;  %v2990_v63 = vsub.f32 %v959_v40, %v2985_v46 }
  0xb9   : > { %672 = vmatmul.f32.gmra.mxu2 %v429_v1 }
  0xbe   : > { %441 = vmatmul.f32.gmra.mxu0 %v440_v13  ;;  %574 = vmatmul.f32.gmra.mxu1 %v428_v51  ;;  %v2995_v13 = vand.u32 4294901760, %v2990_v63 }
  0xc0   : > { %770 = vmatmul.f32.gmra.mxu3 %v438_v49 }
  0xc1   : > { %677 = vmatmul.f32.gmra.mxu2 %v437_v47 }
  0xc6   : > { %578 = vmatmul.f32.gmra.mxu1 %v436_v38  ;;  %839 = vmatmul.f32.vlgmr.msrb.gmra.mxu0 %v2755_v2 }
  0xce   : > { %843 = vmatmul.f32.gmra.mxu0 %v2792_v43  ;;  %912 = vmatmul.f32.vlgmr.msrb.gmra.mxu1 %v2755_v2 }
  0xd6   : > { %847 = vmatmul.f32.gmra.mxu0 %v2835_v37  ;;  %916 = vmatmul.f32.gmra.mxu1 %v2792_v43 }
  0xde   : > { %851 = vmatmul.f32.gmra.mxu0 %v2857_v44  ;;  %920 = vmatmul.f32.gmra.mxu1 %v2835_v37 }
  0xe6   : > { %855 = vmatmul.f32.gmra.mxu0 %v2873_v23  ;;  %924 = vmatmul.f32.gmra.mxu1 %v2857_v44 }
  0xee   : > { %859 = vmatmul.f32.gmra.mxu0 %v2890_v20  ;;  %928 = vmatmul.f32.gmra.mxu1 %v2873_v23 }
  0xf3   : > { %v370_v30 = vpop.f32.mrf.mxu0 }
  0xf6   : > { %863 = vmatmul.f32.gmra.mxu0 %v2907_v28  ;;  %932 = vmatmul.f32.gmra.mxu1 %v2890_v20  ;;  %v952_v20 = vld [vmem:[#allocation10] sm:$0xff] }
  0xf7   : > { %v956_v11 = vsel %vm954_vm0, %v952_v20, 0 }
  0xfb   : > { %v378_v2 = vpop.f32.mrf.mxu0  ;;  %v543_v61 = vpop.f32.mrf.mxu1 }
  0xfc   : > { %v633_v39 = vpop.f32.mrf.mxu2  ;;  %v717_v29 = vpop.f32.mrf.mxu3  ;;  %v544_v5 = vadd.f32 %v543_v61, %v370_v30 }
  0xfe   : > { %867 = vmatmul.f32.gmra.mxu0 %v2923_v48  ;;  %936 = vmatmul.f32.gmra.mxu1 %v2907_v28  ;;  %v634_v25 = vadd.f32 %v633_v39, %v544_v5  ;;  %v2976_v28 = vand.u32 4294901760, %v956_v11 }
 0x100   : > { %v718_v33 = vadd.f32 %v717_v29, %v634_v25  ;;  %v2979_v27 = vsub.f32 %v956_v11, %v2976_v28 }
 0x102   : > { %v2983_v54 = vand.u32 4294901760, %v2979_v27 }
 0x103   : > { %v386_v37 = vpop.f32.mrf.mxu0  ;;  %v547_v43 = vpop.f32.mrf.mxu1 }
 0x104   : > { %v638_v23 = vpop.f32.mrf.mxu2  ;;  %v723_v19 = vpop.f32.mrf.mxu3  ;;  %v548_v34 = vadd.f32 %v547_v43, %v378_v2  ;;  %v982_v56 = vsub.f32 %v2979_v27, %v2983_v54 }
 0x106   : > { %871 = vmatmul.f32.gmra.mxu0 %v428_v51  ;;  %940 = vmatmul.f32.gmra.mxu1 %v2923_v48  ;;  %v639_v42 = vadd.f32 %v638_v23, %v548_v34  ;;  %v2992_v57 = vand.u32 4294901760, %v982_v56 }
 0x108   : > { %v724_v59 = vadd.f32 %v723_v19, %v639_v42 }
 0x10b   : > { %v2957_v7 = vpop.f32.mrf.mxu0  ;;  %v551_v8 = vpop.f32.mrf.mxu1 }
 0x10c   : > { %v643_v9 = vpop.f32.mrf.mxu2  ;;  %v729_v26 = vpop.f32.mrf.mxu3 }
 0x10e   : > { %875 = vmatmul.f32.gmra.mxu0 %v436_v38  ;;  %944 = vmatmul.f32.gmra.mxu1 %v428_v51 }
 0x113   : > { %v2959_v44 = vpop.f32.mrf.mxu0  ;;  %v555_v50 = vpop.f32.mrf.mxu1 }
 0x114   : > { %v648_v48 = vpop.f32.mrf.mxu2  ;;  %v735_v0 = vpop.f32.mrf.mxu3  ;;  %v556_v2 = vadd.f32 %v555_v50, %v2957_v7 }
 0x116   : > { %948 = vmatmul.f32.gmra.mxu1 %v436_v38  ;;  %v552_v38 = vadd.f32 %v551_v8, %v386_v37  ;;  %v990_v8 = vsub.f32 %v2990_v63, %v2995_v13  ;;  %v649_v29 = vadd.f32 %v648_v48, %v556_v2 }
 0x118   : > { %v644_v30 = vadd.f32 %v643_v9, %v552_v38  ;;  %v3001_v50 = vand.u32 4294901760, %v990_v8 }
 0x11a   : > { %v730_v39 = vadd.f32 %v729_v26, %v644_v30 }
 0x11b   : > { %v2961_v53 = vpop.f32.mrf.mxu0  ;;  %v2963_v60 = vpop.f32.mrf.mxu1 }
 0x11c   : > { %v653_v36 = vpop.f32.mrf.mxu2  ;;  %v560_v26 = vadd.f32 %v2963_v60, %v2959_v44 }
 0x123   : > { %v418_v62 = vpop.f32.mrf.mxu0  ;;  %v2965_v6 = vpop.f32.mrf.mxu1 }
 0x124   : > { %v564_v34 = vadd.f32 %v2965_v6, %v2961_v53 }
 0x12b   : > { %v426_v31 = vpop.f32.mrf.mxu0  ;;  %v567_v32 = vpop.f32.mrf.mxu1 }
 0x12c   : > { %v2967_v45 = vadd.f32 %v567_v32, %v418_v62  ;;  %v741_v62 = vpop.f32.mrf.mxu3 }
 0x133   : > { %v434_v55 = vpop.f32.mrf.mxu0  ;;  %v571_v14 = vpop.f32.mrf.mxu1 }
 0x134   : > { %v2969_v15 = vadd.f32 %v571_v14, %v426_v31  ;;  %v747_v11 = vpop.f32.mrf.mxu3 }
 0x13b   : > { %v442_v3 = vpop.f32.mrf.mxu0  ;;  %v575_v16 = vpop.f32.mrf.mxu1 }
 0x13c   : > { %v2971_v4 = vadd.f32 %v575_v16, %v434_v55  ;;  %v658_v16 = vpop.f32.mrf.mxu2  ;;  %v753_v40 = vpop.f32.mrf.mxu3 }
 0x13d   : > { %v659_v48 = vadd.f32 %v658_v16, %v564_v34 }
 0x143   : > { %v579_v22 = vpop.f32.mrf.mxu1  ;;  %v840_v24 = vpop.f32.mrf.mxu0 }
 0x144   : > { %v2973_v10 = vadd.f32 %v579_v22, %v442_v3  ;;  %v841_v35 = vadd.f32 %v840_v24, %v718_v33  ;;  %v736_v3 = vadd.f32 %v735_v0, %v649_v29 }
 0x14b   : > { %v844_v41 = vpop.f32.mrf.mxu0  ;;  %v913_v21 = vpop.f32.mrf.mxu1 }
 0x14c   : > { %v914_v52 = vadd.f32 %v913_v21, %v841_v35  ;;  %v845_v58 = vadd.f32 %v844_v41, %v724_v59  ;;  %v654_v41 = vadd.f32 %v653_v36, %v560_v26  ;;  %v663_v21 = vpop.f32.mrf.mxu2  ;;  %v748_v59 = vadd.f32 %v747_v11, %v659_v48 }
 0x14e   : > { %v977_v51 = vand.u32 4294901760, %v914_v52  ;;  %v742_v6 = vadd.f32 %v741_v62, %v654_v41 }
 0x150   : > { %v1017_v12 = vsub.f32 %v914_v52, %v977_v51 }
 0x152   : > { %v1018_v43 = vand.u32 4294901760, %v1017_v12 }
 0x153   : > { %v848_v1 = vpop.f32.mrf.mxu0  ;;  %v917_v18 = vpop.f32.mrf.mxu1 }
 0x154   : > { %v918_v47 = vadd.f32 %v917_v18, %v845_v58  ;;  %v1019_v14 = vsub.f32 %v1017_v12, %v1018_v43  ;;  %v849_v23 = vadd.f32 %v848_v1, %v730_v39 }
 0x156   : > { %v975_v49 = vand.u32 4294901760, %v918_v47  ;;  %v1020_v5 = vand.u32 4294901760, %v1019_v14 }
 0x158   : > { %v1011_v61 = vsub.f32 %v918_v47, %v975_v49  ;;  %976 = vmatpush.msrb.mxu2 %v975_v49 }
 0x15a   : > { %v1012_v31 = vand.u32 4294901760, %v1011_v61  ;;  %978 = vmatpush.msrb.mxu2 %v977_v51 }
 0x15b   : > { %v852_v32 = vpop.f32.mrf.mxu0  ;;  %v921_v37 = vpop.f32.mrf.mxu1  ;;  %984 = vmatmul.f32.vlgmr.msrb.gmra.mxu2 %v2992_v57 }
 0x15c   : > { %1047 = vmatpush.msra.mxu2 %v1011_v61  ;;  %v1013_v55 = vsub.f32 %v1011_v61, %v1012_v31  ;;  %v922_v19 = vadd.f32 %v921_v37, %v849_v23  ;;  %v853_v20 = vadd.f32 %v852_v32, %v736_v3 }
 0x15e   : > { %1050 = vmatpush.msra.mxu2 %v1017_v12  ;;  %v1014_v7 = vand.u32 4294901760, %v1013_v55  ;;  %v3005_v24 = vand.u32 4294901760, %v922_v19  ;;  %v664_v12 = vadd.f32 %v663_v21, %v2967_v45  ;;  %v759_v45 = vpop.f32.mrf.mxu3 }
 0x160   : > { %1110 = vmatpush.msrb.mxu2 %v1012_v31  ;;  %1015 = vmatpush.msrb.mxu3 %v1014_v7  ;;  %v1207_v17 = vsub.f32 %v922_v19, %v3005_v24  ;;  %v754_v61 = vadd.f32 %v753_v40, %v664_v12 }
 0x162   : > { %1114 = vmatpush.msrb.mxu2 %v1018_v43  ;;  %1021 = vmatpush.msrb.mxu3 %v1020_v5  ;;  %v1208_v53 = vand.u32 4294901760, %v1207_v17 }
 0x163   : > { %v856_v9 = vpop.f32.mrf.mxu0  ;;  %v925_v22 = vpop.f32.mrf.mxu1  ;;  %992 = vmatmul.f32.gmra.mxu2 %v3001_v50  ;;  %1023 = vmatmul.f32.vlgmr.msrb.gmra.mxu3 %v2976_v28 }
 0x164   : > { %v926_v25 = vadd.f32 %v925_v22, %v853_v20  ;;  %1077 = vmatpush.msra.mxu3 %v975_v49  ;;  %v857_v0 = vadd.f32 %v856_v9, %v742_v6 }
 0x166   : > { %v3009_v33 = vand.u32 4294901760, %v926_v25  ;;  %1079 = vmatpush.msra.mxu3 %v977_v51  ;;  %v765_v7 = vpop.f32.mrf.mxu3 }
 0x168   : > { %1139 = vmatpush.msrb.mxu3 %v975_v49  ;;  %v1201_v35 = vsub.f32 %v926_v25, %v3009_v33  ;;  %1329 = vmatpush.msra.mxu1 %v3009_v33  ;;  %v668_v49 = vpop.f32.mrf.mxu2 }
 0x169   : > { %v669_v8 = vadd.f32 %v668_v49, %v2969_v15 }
 0x16a   : > { %1141 = vmatpush.msrb.mxu3 %v977_v51  ;;  %v1202_v42 = vand.u32 4294901760, %v1201_v35  ;;  %1331 = vmatpush.msra.mxu1 %v3005_v24  ;;  %v1209_v51 = vsub.f32 %v1207_v17, %v1208_v53 }
 0x16b   : > { %v860_v44 = vpop.f32.mrf.mxu0  ;;  %v929_v60 = vpop.f32.mrf.mxu1  ;;  %1027 = vmatmul.f32.gmra.mxu3 %v2985_v46  ;;  %1053 = vmatmul.f32.vlgmr.msra.gmra.mxu2 %v2979_v27  ;;  %v760_v55 = vadd.f32 %v759_v45, %v669_v8 }
 0x16c   : > { %1166 = vmatpush.msra.mxu2 %v3009_v33  ;;  %1300 = vmatpush.msra.mxu0 %v1202_v42  ;;  %v1203_v52 = vsub.f32 %v1201_v35, %v1202_v42  ;;  %v861_v58 = vadd.f32 %v860_v44, %v748_v59  ;;  %v930_v1 = vadd.f32 %v929_v60, %v857_v0  ;;  %v1210_v36 = vand.u32 4294901760, %v1209_v51 }
 0x16d   : > { %1333 = vmatmul.f32.vlgmr.msra.gmra.mxu1 %v2976_v28 }
 0x16e   : > { %1168 = vmatpush.msra.mxu2 %v3005_v24  ;;  %1304 = vmatpush.msra.mxu0 %v1208_v53  ;;  %v1204_v18 = vand.u32 4294901760, %v1203_v52  ;;  %v3027_v30 = vand.u32 4294901760, %v930_v1 }
 0x16f   : > { %1306 = vmatmul.f32.vlgmr.msra.gmra.mxu0 %v2976_v28 }
 0x170   : > { %v3037_v62 = vsub.f32 %v930_v1, %v3027_v30  ;;  %v673_v29 = vpop.f32.mrf.mxu2 }
 0x171   : > { %v674_v25 = vadd.f32 %v673_v29, %v2971_v4 }
 0x173   : > { %v864_v56 = vpop.f32.mrf.mxu0  ;;  %v933_v38 = vpop.f32.mrf.mxu1  ;;  %1058 = vmatmul.f32.gmra.mxu2 %v2990_v63  ;;  %1083 = vmatmul.f32.vlgmr.msra.gmra.mxu3 %v2983_v54  ;;  %v766_v41 = vadd.f32 %v765_v7, %v674_v25 }
 0x174   : > { %v934_v47 = vadd.f32 %v933_v38, %v861_v58  ;;  %1205 = vmatpush.msra.mxu3 %v1204_v18  ;;  %v865_v31 = vadd.f32 %v864_v56, %v754_v61 }
 0x175   : > { %1337 = vmatmul.f32.gmra.mxu1 %v2985_v46 }
 0x176   : > { %v3029_v2 = vand.u32 4294901760, %v934_v47  ;;  %1211 = vmatpush.msra.mxu3 %v1210_v36 }
 0x177   : > { %1310 = vmatmul.f32.gmra.mxu0 %v2985_v46 }
 0x178   : > { %v3033_v43 = vsub.f32 %v934_v47, %v3029_v2  ;;  %1457 = vmatpush.msrb.mxu1 %v3029_v2  ;;  %v678_v22 = vpop.f32.mrf.mxu2 }
 0x17a   : > { %1427 = vmatpush.msrb.mxu0 %v3033_v43  ;;  %1459 = vmatpush.msrb.mxu1 %v3027_v30  ;;  %v1392_v11 = vand.u32 4294901760, %v3033_v43 }
 0x17b   : > { %v868_v32 = vpop.f32.mrf.mxu0  ;;  %v937_v37 = vpop.f32.mrf.mxu1  ;;  %1089 = vmatmul.f32.gmra.mxu3 %v2995_v13  ;;  %1116 = vmatmul.f32.vlgmr.msrb.gmra.mxu2 %v2976_v28 }
 0x17c   : > { %v938_v39 = vadd.f32 %v937_v37, %v865_v31  ;;  %1237 = vmatpush.msrb.mxu2 %v1201_v35  ;;  %1430 = vmatpush.msrb.mxu0 %v3037_v62  ;;  %v869_v23 = vadd.f32 %v868_v32, %v760_v55  ;;  %v771_v35 = vpop.f32.mrf.mxu3  ;;  %v1393_v21 = vsub.f32 %v3033_v43, %v1392_v11 }
 0x17d   : > { %1463 = vmatmul.f32.vlgmr.msrb.gmra.mxu1 %v2983_v54 }
 0x17e   : > { %1240 = vmatpush.msrb.mxu2 %v1207_v17  ;;  %v3047_v14 = vand.u32 4294901760, %v938_v39  ;;  %v1398_v17 = vand.u32 4294901760, %v3037_v62  ;;  %v1394_v40 = vand.u32 4294901760, %v1393_v21 }
 0x17f   : > { %1433 = vmatmul.f32.vlgmr.msrb.gmra.mxu0 %v2979_v27 }
 0x180   : > { %v3052_v15 = vsub.f32 %v938_v39, %v3047_v14  ;;  %v1399_v53 = vsub.f32 %v3037_v62, %v1398_v17 }
 0x182   : > { %v1588_v9 = vand.u32 4294901760, %v3052_v15  ;;  %v1400_v51 = vand.u32 4294901760, %v1399_v53 }
 0x183   : > { %v941_v3 = vpop.f32.mrf.mxu1  ;;  %1120 = vmatmul.f32.gmra.mxu2 %v2985_v46  ;;  %1143 = vmatmul.f32.vlgmr.msrb.gmra.mxu3 %v2976_v28  ;;  %v872_v19 = vpop.f32.mrf.mxu0 }
 0x184   : > { %v942_v16 = vadd.f32 %v941_v3, %v869_v23  ;;  %1267 = vmatpush.msrb.mxu3 %v3009_v33  ;;  %v1589_v4 = vsub.f32 %v3052_v15, %v1588_v9  ;;  %v873_v60 = vadd.f32 %v872_v19, %v766_v41 }
 0x185   : > { %1469 = vmatmul.f32.gmra.mxu1 %v2995_v13 }
 0x186   : > { %v3056_v5 = vand.u32 4294901760, %v942_v16  ;;  %1269 = vmatpush.msrb.mxu3 %v3005_v24  ;;  %v679_v24 = vadd.f32 %v678_v22, %v2973_v10  ;;  %v1590_v48 = vand.u32 4294901760, %v1589_v4 }
 0x187   : > { %1438 = vmatmul.f32.gmra.mxu0 %v2990_v63 }
 0x188   : > { %v3061_v20 = vsub.f32 %v942_v16, %v3056_v5  ;;  %1546 = vmatpush.msra.mxu0 %v3056_v5  ;;  %v772_v10 = vadd.f32 %v771_v35, %v679_v24 }
 0x18a   : > { %v1582_v26 = vand.u32 4294901760, %v3061_v20  ;;  %1548 = vmatpush.msra.mxu0 %v3047_v14 }
 0x18b   : > { %v945_v33 = vpop.f32.mrf.mxu1  ;;  %1147 = vmatmul.f32.gmra.mxu3 %v2985_v46  ;;  %1174 = vmatmul.f32.vlgmr.msra.gmra.mxu2 %v2992_v57  ;;  %v876_v44 = vpop.f32.mrf.mxu0 }
 0x18c   : > { %v1583_v34 = vsub.f32 %v3061_v20, %v1582_v26  ;;  %1356 = vmatpush.msra.mxu2 %v3029_v2  ;;  %1680 = vmatpush.msrb.mxu0 %v1582_v26  ;;  %v877_v6 = vadd.f32 %v876_v44, %v772_v10  ;;  %v946_v52 = vadd.f32 %v945_v33, %v873_v60 }
 0x18e   : > { %1358 = vmatpush.msra.mxu2 %v3027_v30  ;;  %1684 = vmatpush.msrb.mxu0 %v1588_v9  ;;  %v1584_v42 = vand.u32 4294901760, %v1583_v34  ;;  %v1737_v58 = vand.u32 4294901760, %v946_v52 }
 0x18f   : > { %1554 = vmatmul.f32.vlgmr.msra.gmra.mxu0 %v2992_v57 }
 0x190   : > { %1585 = vmatpush.msra.mxu1 %v1584_v42  ;;  %v1777_v56 = vsub.f32 %v946_v52, %v1737_v58 }
 0x192   : > { %1591 = vmatpush.msra.mxu1 %v1590_v48  ;;  %v1778_v12 = vand.u32 4294901760, %v1777_v56 }
 0x193   : > { %v949_v59 = vpop.f32.mrf.mxu1  ;;  %1182 = vmatmul.f32.gmra.mxu2 %v3001_v50  ;;  %1213 = vmatmul.f32.vlgmr.msra.gmra.mxu3 %v2976_v28 }
 0x194   : > { %v950_v0 = vadd.f32 %v949_v59, %v877_v6  ;;  %1395 = vmatpush.msra.mxu3 %v1394_v40  ;;  %1709 = vmatpush.msrb.mxu1 %v3056_v5  ;;  %v1779_v36 = vsub.f32 %v1777_v56, %v1778_v12 }
 0x195   : > { %1593 = vmatmul.f32.vlgmr.msra.gmra.mxu1 %v2976_v28 }
 0x196   : > { %v1735_v1 = vand.u32 4294901760, %v950_v0  ;;  %1401 = vmatpush.msra.mxu3 %v1400_v51  ;;  %1711 = vmatpush.msrb.mxu1 %v3047_v14 }
 0x197   : > { %1562 = vmatmul.f32.gmra.mxu0 %v3001_v50 }
 0x198   : > { %v1771_v18 = vsub.f32 %v950_v0, %v1735_v1  ;;  %1837 = vmatpush.msra.mxu1 %v1735_v1 }
 0x19a   : > { %1807 = vmatpush.msra.mxu0 %v1771_v18  ;;  %1839 = vmatpush.msra.mxu1 %v1737_v58  ;;  %v1772_v38 = vand.u32 4294901760, %v1771_v18 }
 0x19b   : > { %1217 = vmatmul.f32.gmra.mxu3 %v2985_v46  ;;  %1243 = vmatmul.f32.vlgmr.msrb.gmra.mxu2 %v2979_v27 }
 0x19c   : > { %1490 = vmatpush.msrb.mxu2 %v1392_v11  ;;  %1810 = vmatpush.msra.mxu0 %v1777_v56  ;;  %v1773_v47 = vsub.f32 %v1771_v18, %v1772_v38 }
 0x19d   : > { %1597 = vmatmul.f32.gmra.mxu1 %v2985_v46 }
 0x19e   : > { %1494 = vmatpush.msrb.mxu2 %v1398_v17  ;;  %v1774_v49 = vand.u32 4294901760, %v1773_v47 }
 0x19f   : > { %1686 = vmatmul.f32.vlgmr.msrb.gmra.mxu0 %v2976_v28 }
 0x1a3   : > { %1248 = vmatmul.f32.gmra.mxu2 %v2990_v63  ;;  %1273 = vmatmul.f32.vlgmr.msrb.gmra.mxu3 %v2983_v54 }
 0x1a4   : > { %1519 = vmatpush.msrb.mxu3 %v3029_v2 }
 0x1a5   : > { %1713 = vmatmul.f32.vlgmr.msrb.gmra.mxu1 %v2976_v28 }
 0x1a6   : > { %1521 = vmatpush.msrb.mxu3 %v3027_v30  ;;  %v1780_v30 = vand.u32 4294901760, %v1779_v36 }
 0x1a7   : > { %1690 = vmatmul.f32.gmra.mxu0 %v2985_v46 }
 0x1ab   : > { %1279 = vmatmul.f32.gmra.mxu3 %v2995_v13  ;;  %1364 = vmatmul.f32.vlgmr.msra.gmra.mxu2 %v2992_v57 }
 0x1ac   : > { %1617 = vmatpush.msra.mxu2 %v3061_v20 }
 0x1ad   : > { %1717 = vmatmul.f32.gmra.mxu1 %v2985_v46 }
 0x1ae   : > { %1620 = vmatpush.msra.mxu2 %v3052_v15 }
 0x1af   : > { %1813 = vmatmul.f32.vlgmr.msra.gmra.mxu0 %v2979_v27 }
 0x1b3   : > { %1372 = vmatmul.f32.gmra.mxu2 %v3001_v50  ;;  %1403 = vmatmul.f32.vlgmr.msra.gmra.mxu3 %v2976_v28 }
 0x1b4   : > { %1647 = vmatpush.msra.mxu3 %v3056_v5 }
 0x1b5   : > { %1843 = vmatmul.f32.vlgmr.msra.gmra.mxu1 %v2983_v54 }
 0x1b6   : > { %1649 = vmatpush.msra.mxu3 %v3047_v14 }
 0x1b7   : > { %1818 = vmatmul.f32.gmra.mxu0 %v2990_v63 }
 0x1bb   : > { %1407 = vmatmul.f32.gmra.mxu3 %v2985_v46  ;;  %1496 = vmatmul.f32.vlgmr.msrb.gmra.mxu2 %v2976_v28 }
 0x1bc   : > { %1736 = vmatpush.msrb.mxu2 %v1735_v1 }
 0x1bd   : > { %1849 = vmatmul.f32.gmra.mxu1 %v2995_v13 }
 0x1be   : > { %1738 = vmatpush.msrb.mxu2 %v1737_v58 }
 0x1c3   : > { %1500 = vmatmul.f32.gmra.mxu2 %v2985_v46  ;;  %1523 = vmatmul.f32.vlgmr.msrb.gmra.mxu3 %v2976_v28 }
 0x1c4   : > { %1775 = vmatpush.msrb.mxu3 %v1774_v49 }
 0x1c6   : > { %1781 = vmatpush.msrb.mxu3 %v1780_v30 }
 0x1cb   : > { %1527 = vmatmul.f32.gmra.mxu3 %v2985_v46  ;;  %1623 = vmatmul.f32.vlgmr.msra.gmra.mxu2 %v2979_v27 }
 0x1cc   : > { %1870 = vmatpush.msra.mxu2 %v1772_v38 }
 0x1ce   : > { %1874 = vmatpush.msra.mxu2 %v1778_v12 }
 0x1d3   : > { %1653 = vmatmul.f32.vlgmr.msra.gmra.mxu3 %v2983_v54  ;;  %1628 = vmatmul.f32.gmra.mxu2 %v2990_v63 }
 0x1d4   : > { %1899 = vmatpush.msra.mxu3 %v1735_v1 }
 0x1d6   : > { %1901 = vmatpush.msra.mxu3 %v1737_v58 }
 0x1db   : > { %1659 = vmatmul.f32.gmra.mxu3 %v2995_v13  ;;  %1744 = vmatmul.f32.vlgmr.msrb.gmra.mxu2 %v2992_v57 }
 0x1de   : > { %v985_v2 = vpop.f32.mrf.mxu2 }
 0x1e3   : > { %1783 = vmatmul.f32.vlgmr.msrb.gmra.mxu3 %v2976_v28  ;;  %1752 = vmatmul.f32.gmra.mxu2 %v3001_v50 }
 0x1e6   : > { %v1024_v61 = vpop.f32.mrf.mxu3  ;;  %v993_v43 = vpop.f32.mrf.mxu2 }
 0x1e7   : > { %v1025_v27 = vadd.f32 %v1024_v61, %v985_v2 }
 0x1ea   : > { %v1334_v20 = vpop.f32.mrf.mxu1 }
 0x1eb   : > { %1787 = vmatmul.f32.gmra.mxu3 %v2985_v46  ;;  %1876 = vmatmul.f32.vlgmr.msra.gmra.mxu2 %v2976_v28 }
 0x1ec   : > { %v1307_v5 = vpop.f32.mrf.mxu0 }
 0x1ee   : > { %v1028_v54 = vpop.f32.mrf.mxu3  ;;  %v1054_v63 = vpop.f32.mrf.mxu2 }
 0x1ef   : > { %v1029_v45 = vadd.f32 %v1028_v54, %v993_v43  ;;  %v1055_v62 = vadd.f32 %v1054_v63, %v1025_v27 }
 0x1f2   : > { %v1338_v26 = vpop.f32.mrf.mxu1 }
 0x1f3   : > { %1903 = vmatmul.f32.vlgmr.msra.gmra.mxu3 %v2976_v28  ;;  %1880 = vmatmul.f32.gmra.mxu2 %v2985_v46 }
 0x1f4   : > { %v1311_v11 = vpop.f32.mrf.mxu0 }
 0x1f6   : > { %v1084_v57 = vpop.f32.mrf.mxu3  ;;  %v1059_v13 = vpop.f32.mrf.mxu2 }
 0x1f7   : > { %v1085_v31 = vadd.f32 %v1084_v57, %v1055_v62  ;;  %v1060_v32 = vadd.f32 %v1059_v13, %v1029_v45 }
 0x1fa   : > { %v1464_v10 = vpop.f32.mrf.mxu1 }
 0x1fb   : > { %1907 = vmatmul.f32.gmra.mxu3 %v2985_v46 }
 0x1fc   : > { %v1434_v41 = vpop.f32.mrf.mxu0 }
 0x1fe   : > { %v1090_v50 = vpop.f32.mrf.mxu3  ;;  %v1117_v37 = vpop.f32.mrf.mxu2 }
 0x1ff   : > { %v1091_v8 = vadd.f32 %v1090_v50, %v1060_v32  ;;  %v1118_v39 = vadd.f32 %v1117_v37, %v1085_v31 }
 0x202   : > { %v1470_v36 = vpop.f32.mrf.mxu1 }
 0x204   : > { %v1439_v1 = vpop.f32.mrf.mxu0 }
 0x206   : > { %v1144_v29 = vpop.f32.mrf.mxu3  ;;  %v1121_v55 = vpop.f32.mrf.mxu2 }
 0x207   : > { %v1145_v14 = vadd.f32 %v1144_v29, %v1118_v39  ;;  %v1122_v23 = vadd.f32 %v1121_v55, %v1091_v8 }
 0x209   : > { %v1929_v17 = vmul.f32 2.0, %v1145_v14  ;;  %v1911_v21 = vmul.f32 %v1145_v14, %v1145_v14 }
 0x20c   : > { %v1555_v61 = vpop.f32.mrf.mxu0 }
 0x20e   : > { %v1148_v7 = vpop.f32.mrf.mxu3  ;;  %v1175_v3 = vpop.f32.mrf.mxu2 }
 0x20f   : > { %v1149_v15 = vadd.f32 %v1148_v7, %v1122_v23 }
 0x211   : > { %v1930_v0 = vmul.f32 2.0, %v1149_v15  ;;  %v3134_v18 = vmul.f32 %v1149_v15, %v1149_v15 }
 0x212   : > { %v1594_v43 = vpop.f32.mrf.mxu1 }
 0x213   : > { %v1595_v32 = vadd.f32 %v1594_v43, %v1555_v61 }
 0x214   : > { %v1563_v63 = vpop.f32.mrf.mxu0 }
 0x216   : > { %v1214_v28 = vpop.f32.mrf.mxu3  ;;  %v1183_v16 = vpop.f32.mrf.mxu2 }
 0x217   : > { %v1215_v19 = vadd.f32 %v1214_v28, %v1175_v3 }
 0x21a   : > { %v1598_v62 = vpop.f32.mrf.mxu1 }
 0x21b   : > { %v1599_v28 = vadd.f32 %v1598_v62, %v1563_v63 }
 0x21c   : > { %v1687_v8 = vpop.f32.mrf.mxu0 }
 0x21e   : > { %v1218_v9 = vpop.f32.mrf.mxu3  ;;  %v1244_v22 = vpop.f32.mrf.mxu2 }
 0x21f   : > { %v1219_v25 = vadd.f32 %v1218_v9, %v1183_v16  ;;  %v1245_v46 = vadd.f32 %v1244_v22, %v1215_v19 }
 0x222   : > { %v1714_v55 = vpop.f32.mrf.mxu1 }
 0x226   : > { %v1274_v33 = vpop.f32.mrf.mxu3  ;;  %v1249_v24 = vpop.f32.mrf.mxu2 }
 0x227   : > { %v1275_v34 = vadd.f32 %v1274_v33, %v1245_v46  ;;  %v1250_v44 = vadd.f32 %v1249_v24, %v1219_v25  ;;  %v1691_v46 = vpop.f32.mrf.mxu0 }
 0x229   : > { %v1308_v4 = vadd.f32 %v1307_v5, %v1275_v34 }
 0x22b   : > { %v1335_v35 = vadd.f32 %v1334_v20, %v1308_v4 }
 0x22d   : > { %v3126_v42 = vmul.f32 %v1929_v17, %v1335_v35  ;;  %v1917_v60 = vmul.f32 %v1335_v35, %v1335_v35  ;;  %v3128_v48 = vmul.f32 %v1335_v35, %v1145_v14  ;;  %v3145_v17 = vstv %s309_s30  ;;  %v1718_v35 = vpop.f32.mrf.mxu1 }
 0x22e   : > { %v1280_v53 = vpop.f32.mrf.mxu3  ;;  %v1365_v6 = vpop.f32.mrf.mxu2 }
 0x22f   : > { %v1281_v52 = vadd.f32 %v1280_v53, %v1250_v44  ;;  %v3130_v40 = vadd.f32 %v1917_v60, %v1911_v21 }
 0x231   : > { %v1312_v59 = vadd.f32 %v1311_v11, %v1281_v52 }
 0x233   : > { %v1339_v51 = vadd.f32 %v1338_v26, %v1312_v59 }
 0x235   : > { %v3132_v58 = vmul.f32 %v1930_v0, %v1339_v51  ;;  %v3136_v56 = vmul.f32 %v1339_v51, %v1339_v51  ;;  %v3138_v38 = vmul.f32 %v1339_v51, %v1149_v15 }
 0x236   : > { %v1404_v12 = vpop.f32.mrf.mxu3  ;;  %v1373_v47 = vpop.f32.mrf.mxu2 }
 0x237   : > { %v3142_v49 = vadd.f32 %v3136_v56, %v3134_v18  ;;  %v1405_v45 = vadd.f32 %v1404_v12, %v1365_v6 }
 0x239   : > { %v1435_v31 = vadd.f32 %v1434_v41, %v1405_v45 }
 0x23b   : > { %v1465_v50 = vadd.f32 %v1464_v10, %v1435_v31  ;;  %v3147_v10 = vstv %s307_s19 }
 0x23e   : > { %v1408_v30 = vpop.f32.mrf.mxu3  ;;  %v1497_v2 = vpop.f32.mrf.mxu2 }
 0x23f   : > { %v1409_v37 = vadd.f32 %v1408_v30, %v1373_v47  ;;  %v1498_v39 = vadd.f32 %v1497_v2, %v1465_v50  ;;  %v1944_v30 = vadd.f32 %v3142_v49, %v3147_v10 }
 0x241   : > { %v1440_v7 = vadd.f32 %v1439_v1, %v1409_v37 }
 0x243   : > { %v1471_v19 = vadd.f32 %v1470_v36, %v1440_v7  ;;  %v1814_v36 = vpop.f32.mrf.mxu0 }
 0x246   : > { %v1524_v27 = vpop.f32.mrf.mxu3  ;;  %v1501_v54 = vpop.f32.mrf.mxu2 }
 0x247   : > { %v1525_v3 = vadd.f32 %v1524_v27, %v1498_v39  ;;  %v1502_v9 = vadd.f32 %v1501_v54, %v1471_v19  ;;  %v1844_v27 = vpop.f32.mrf.mxu1 }
 0x249   : > { %v1913_v5 = vsub.f32 %v1525_v3, %v1911_v21 }
 0x24b   : > { %v1915_v33 = vmul.f32 1.0208334, %v1913_v5 }
 0x24e   : > { %v1528_v57 = vpop.f32.mrf.mxu3  ;;  %v1624_v13 = vpop.f32.mrf.mxu2 }
 0x24f   : > { %v1625_v29 = vadd.f32 %v1624_v13, %v1595_v32  ;;  %v1529_v24 = vadd.f32 %v1528_v57, %v1502_v9  ;;  %v1819_v13 = vpop.f32.mrf.mxu0  ;;  %v1983_v9 = vlaneseq }
 0x251   : > { %v1914_v21 = vsub.f32 %v1529_v24, %v3134_v18 }
 0x253   : > { %v1916_v1 = vmul.f32 1.0208334, %v1914_v21 }
 0x256   : > { %v1654_v14 = vpop.f32.mrf.mxu3  ;;  %v1629_v23 = vpop.f32.mrf.mxu2 }
 0x257   : > { %v1655_v15 = vadd.f32 %v1654_v14, %v1625_v29  ;;  %v1630_v25 = vadd.f32 %v1629_v23, %v1599_v28  ;;  %v1850_v29 = vpop.f32.mrf.mxu1 }
 0x259   : > { %v1688_v16 = vadd.f32 %v1687_v8, %v1655_v15 }
 0x25b   : > { %v1715_v20 = vadd.f32 %v1714_v55, %v1688_v16 }
 0x25d   : > { %v1919_v22 = vsub.f32 %v1715_v20, %v1917_v60  ;;  %v1943_v60 = vadd.f32 %v3130_v40, %v3147_v10  ;;  %v1934_v20 = vadd.f32 %v3147_v10, %v3126_v42 }
 0x25e   : > { %v1660_v11 = vpop.f32.mrf.mxu3  ;;  %v1745_v26 = vpop.f32.mrf.mxu2 }
 0x25f   : > { %v1921_v34 = vmul.f32 1.0208334, %v1919_v22  ;;  %v1661_v4 = vadd.f32 %v1660_v11, %v1630_v25 }
 0x261   : > { %v1945_v41 = vadd.f32 %v1921_v34, %v1915_v33  ;;  %v1692_v44 = vadd.f32 %v1691_v46, %v1661_v4  ;;  %v1984_v34 = vshrl.u32 %v1983_v9, 7 }
 0x263   : > { %v1947_v53 = vadd.f32 %v1945_v41, %v3145_v17  ;;  %v1719_v6 = vadd.f32 %v1718_v35, %v1692_v44 }
 0x265   : > { %v1951_v52 = vmul.f32 %v1947_v53, %v1943_v60  ;;  %v1920_v59 = vsub.f32 %v1719_v6, %v3136_v56  ;;  %v1985_v53 = vadd.s32 8, %v1984_v34  ;;  %v1935_v6 = vadd.f32 %v3147_v10, %v3132_v58 }
 0x266   : > { %v1784_v0 = vpop.f32.mrf.mxu3  ;;  %v1753_v51 = vpop.f32.mrf.mxu2 }
 0x267   : > { %2221 = vrcp.f32 %v1951_v52  ;;  %v1922_v12 = vmul.f32 1.0208334, %v1920_v59  ;;  %v1785_v2 = vadd.f32 %v1784_v0, %v1745_v26  ;;  %v1964_v28 = vand.u32 2147483648, %v1951_v52 }
 0x268   : > { %vm1958_vm2 = vweird.f32 %v1951_v52  ;;  %v1962_v19 = vand.u32 2147483647, %v1951_v52  ;;  %vm1989_vm9 = vcmp.lt.s32.totalorder %v1985_v53, 10 }
 0x269   : > { %v1946_v47 = vadd.f32 %v1922_v12, %v1916_v1  ;;  %v1815_v56 = vadd.f32 %v1814_v36, %v1785_v2  ;;  %v1965_v26 = vor.u32 1.1754944e-38, %v1964_v28 }
 0x26a   : > { %vm1963_vm4 = vcmp.eq.f32.partialorder %v1962_v19, 8.507059e+37 }
 0x26b   : > { %v1948_v18 = vadd.f32 %v1946_v47, %v3145_v17  ;;  %v1845_v62 = vadd.f32 %v1844_v27, %v1815_v56 }
 0x26d   : > { %v2222_v40 = vpop.eup %2221  ;;  %v1952_v61 = vmul.f32 %v1948_v18, %v1944_v30 }
 0x26e   : > { %v1788_v43 = vpop.f32.mrf.mxu3  ;;  %v1954_v54 = vmul.f32 %v2222_v40, %v1951_v52  ;;  %v1877_v63 = vpop.f32.mrf.mxu2  ;;  %vm1959_vm1 = vweird.f32 %v2222_v40  ;;  %v1987_v52 = vand.u32 127, %v1983_v9 }
 0x26f   : > { %2223 = vrcp.f32 %v1952_v61  ;;  %v1789_v45 = vadd.f32 %v1788_v43, %v1753_v51  ;;  %v1878_v32 = vadd.f32 %v1877_v63, %v1845_v62  ;;  %vm1960_vm3 = vmor %vm1958_vm2, %vm1959_vm1  ;;  %v1978_v42 = vand.u32 2147483648, %v1952_v61 }
 0x270   : > { %v1955_v57 = vsub.f32 1.0, %v1954_v54  ;;  %vm1972_vm6 = vweird.f32 %v1952_v61  ;;  %v1976_v60 = vand.u32 2147483647, %v1952_v61  ;;  %vm1990_vm10 = vcmp.lt.s32.totalorder %v1987_v52, 10 }
 0x271   : > { %v1820_v39 = vadd.f32 %v1819_v13, %v1789_v45  ;;  %vm1992_vm11 = vmand %vm1989_vm9, %vm1990_vm10 }
 0x272   : > { %v1956_v8 = vmul.f32 %v2222_v40, %v1955_v57  ;;  %vm1977_vm8 = vcmp.eq.f32.partialorder %v1976_v60, 8.507059e+37 }
 0x273   : > { %v1851_v3 = vadd.f32 %v1850_v29, %v1820_v39 }
 0x274   : > { %v1957_v7 = vadd.f32 %v2222_v40, %v1956_v8 }
 0x275   : > { %v2224_v31 = vpop.eup %2223 }
 0x276   : > { %v1904_v50 = vpop.f32.mrf.mxu3  ;;  %v1968_v37 = vmul.f32 %v2224_v31, %v1952_v61  ;;  %v1881_v14 = vpop.f32.mrf.mxu2  ;;  %vm1973_vm5 = vweird.f32 %v2224_v31 }
 0x277   : > { %v1905_v49 = vadd.f32 %v1904_v50, %v1878_v32  ;;  %v1882_v5 = vadd.f32 %v1881_v14, %v1851_v3  ;;  %vm1974_vm7 = vmor %vm1972_vm6, %vm1973_vm5 }
 0x278   : > { %v1969_v15 = vsub.f32 1.0, %v1968_v37 }
 0x279   : > { %v1925_v55 = vsub.f32 %v1905_v49, %v3128_v48  ;;  %v1961_v48 = vsel %vm1960_vm3, %v2222_v40, %v1957_v7 }
 0x27a   : > { %v1970_v11 = vmul.f32 %v2224_v31, %v1969_v15  ;;  %v1966_v4 = vsel %vm1963_vm4, %v1965_v26, %v1961_v48 }
 0x27b   : > { %v1927_v23 = vmul.f32 1.0208334, %v1925_v55 }
 0x27c   : > { %v1971_v44 = vadd.f32 %v2224_v31, %v1970_v11 }
 0x27d   : > { %v1936_v16 = vmul.f32 2.0, %v1927_v23 }
 0x27e   : > { %v1908_v22 = vpop.f32.mrf.mxu3  ;;  %v1975_v0 = vsel %vm1974_vm7, %v2224_v31, %v1971_v44 }
 0x27f   : > { %v1939_v25 = vadd.f32 %v3145_v17, %v1936_v16  ;;  %v1909_v46 = vadd.f32 %v1908_v22, %v1882_v5 }
 0x281   : > { %v1949_v33 = vmul.f32 %v1939_v25, %v1934_v20  ;;  %v1926_v24 = vsub.f32 %v1909_v46, %v3138_v38  ;;  %v1979_v38 = vor.u32 1.1754944e-38, %v1978_v42 }
 0x283   : > { %v1981_v35 = vmul.f32 %v1966_v4, %v1949_v33  ;;  %v1928_v41 = vmul.f32 1.0208334, %v1926_v24  ;;  %v1980_v1 = vsel %vm1977_vm8, %v1979_v38, %v1975_v0 }
 0x285   : > { %v1937_v21 = vmul.f32 2.0, %v1928_v41  ;;  %v1993_v12 = vsub.f32 1.0, %v1981_v35 }
 0x287   : > { %v1940_v59 = vadd.f32 %v3145_v17, %v1937_v21  ;;  %v1995_v30 = vsel %vm1990_vm10, %v1993_v12, 0.0 }
 0x289   : > { %v1950_v51 = vmul.f32 %v1940_v59, %v1935_v6 }
 0x28b   : > { %v1982_v47 = vmul.f32 %v1980_v1, %v1950_v51 }
 0x28d   : > { %v1994_v36 = vsub.f32 1.0, %v1982_v47 }
 0x28f   : > { %v1996_v18 = vsel %vm1992_vm11, %v1994_v36, 0.0 }
 0x290   : > { %v1997_v58 = vadd.f32 %v1996_v18, %v1995_v30 }
 0x292   : > { %v1998_v10 = vrot.slane %v1997_v58, 4 }
 0x294   : > { %v1999_v2 = vadd.f32 %v1998_v10, %v1997_v58 }
 0x296   : > { %v2000_v17 = vrot.slane %v1999_v2, 2 }
 0x298   : > { %v2001_v40 = vadd.f32 %v2000_v17, %v1999_v2 }
 0x29a   : > { %v2002_v61 = vrot.slane %v2001_v40, 1 }
 0x29c   : > { %v2003_v43 = vadd.f32 %v2002_v61, %v2001_v40 }
 0x29e   : > { %2004 = vst [vmem:[%s300_s3] sm:$0x1] %v2003_v43 }
 0x29f   : > { %2384 = shalt.err (!%p2381_p11)
}
 0x2a0   : > { %2158 = dma.vmem_to_hbm [thread:$0]  (%p2549_p3), %s2017_s6, 16, %s2019_s10, %s2006_s18  }
 0x2a1 PF: > { %s2030_s29 = sand.u32 1, %s2425_s22   ;;  %p3234_p12 = scmp.ge.s32.totalorder %s2437_s0, 2 }
 0x2a2   : > { %s2031_s12 = scalar_lea.sflag [#allocation6], %s2030_s29 }
 0x2a3   : > { %p2175_p13 = pnand %p3234_p12, %p2512_p6 }
 0x2a5   : > { %p2176_p0 = pneg %p2175_p13 }
 0x2a7   : > { %2420 = dma.done.wait (%p2176_p0), %s2031_s12, 16  }
 0x2a8   : > { %2422 = vsyncadd (%p2176_p0), %s2031_s12, 4294967280  ;;  %p30_p5 = scmp.ge.s32.totalorder %s2539_s17, 4   ;;  %s3235_s22 = smov %s2429_s23 }
 0x2a9   : > { %s3236_s23 = smov %s2433_s24  ;;  %s3237_s24 = smov %s2555_s21 }
 0x2aa   : > { %s3238_s0 = smov %s2539_s17  ;;  %32 = sbr.rel (!%p30_p5) target bundleno = 16 (0x10), region = 102 }
 0x2af   :  { %2036 = vsyncpa [#allocation5], 1 }
 0x2b0   :  { %2038 = vsyncpa [#allocation5 + $0x1], 1 }
 0x2b1   :  { %2039 = vsyncpa [#allocation8], 1 }
 0x2b2   :  { %2041 = vsyncpa [#allocation8 + $0x1], 1 }
 0x2b3   :  { %2042 = vsyncpa [#allocation11], 1 }
 0x2b4   :  { %2043 = vsyncpa [#allocation6], 1 }
 0x2b5   :  { %2045 = vsyncpa [#allocation6 + $0x1], 1 }

</bundles_post_ra>
